<compile_context>
chip_gen: v5e
topology: v5e:2x2
jax: 0.10.0
libtpu: 0.0.40
codegen_flags: <defaults>
</compile_context>

<pallas_src>
import math

import jax
import jax.numpy as jnp
from jax.experimental import pallas as pl
from jax.experimental.pallas import tpu as pltpu


def _round_up(x, m):
    return ((x + m - 1) // m) * m


def _cdiv(a, b):
    return (a + b - 1) // b


def _tpu_defaults():
    """(tile_r, tile_kv, num_tensorcores, physical_vmem_bytes) per generation."""
    kind = ""
    try:
        kind = jax.devices()[0].device_kind.lower()
    except Exception:
        pass
    phys_vmem = None
    try:
        phys_vmem = int(pltpu.get_tpu_info().vmem_capacity_bytes)
    except Exception:
        phys_vmem = None
    if "v5 lite" in kind or "v5e" in kind or "v5lite" in kind:
        tr, tkv, cores, default_vmem = 128, 128, 1, 128 * 2 ** 20
    elif "v7" in kind:
        tr, tkv, cores, default_vmem = 256, 256, 2, 64 * 2 ** 20
    else:  # v6e / v5p / unknown
        tr, tkv, cores, default_vmem = 512, 256, 1, 128 * 2 ** 20
    if phys_vmem is None:
        phys_vmem = default_vmem
    return tr, tkv, cores, phys_vmem


def _make_kernel(*, is_layer_norm, scale, d_real, d_pad, lu_real, lu_pad,
                 tile_kv, ffn_chunk, ln_eps, approx_recip):
    """Per-(batch, row-tile) flash-attention + FFN kernel body."""
    need_kv_mask = lu_pad != lu_real
    need_d_mask = is_layer_norm and (d_pad != d_real)
    inv_d = 1.0 / float(d_real)
    n_ffn_chunks = d_pad // ffn_chunk

    def kernel(q_ref, k_ref, v_ref, w1_ref, b1_ref, w2_ref, b2_ref,
               g_ref, be_ref, o_ref, m_sc, l_sc, acc_sc):
        kv = pl.program_id(2)

        @pl.when(kv == 0)
        def _init():
            m_sc[...] = jnp.full(m_sc.shape, -jnp.inf, dtype=jnp.float32)
            l_sc[...] = jnp.zeros(l_sc.shape, dtype=jnp.float32)
            acc_sc[...] = jnp.zeros(acc_sc.shape, dtype=jnp.float32)

        q = q_ref[0]          # (tile_r, d_pad)  caller/compute dtype
        k = k_ref[0]          # (tile_kv, d_pad)
        v = v_ref[0]          # (tile_kv, d_pad)

        # Q @ K^T contracting the last dim of both (no in-kernel transpose).
        # NOTE: scores must stay f32 — the -1e30 padded-key mask would
        # overflow if the score dtype were ever lowered to bf16.
        s = jax.lax.dot_general(
            q, k, dimension_numbers=(((1,), (1,)), ((), ())),
            preferred_element_type=jnp.float32) * scale

        if need_kv_mask:
            col = jax.lax.broadcasted_iota(jnp.int32, s.shape, 1) + kv * tile_kv
            s = jnp.where(col < lu_real, s, -1e30)

        # Online softmax update (f32 state in scratch).
        m_prev = m_sc[...]
        m_new = jnp.maximum(m_prev, jnp.max(s, axis=-1, keepdims=True))
        alpha = jnp.exp(m_prev - m_new)
        p = jnp.exp(s - m_new)
        l_sc[...] = alpha * l_sc[...] + jnp.sum(p, axis=-1, keepdims=True)
        acc_sc[...] = alpha * acc_sc[...] + jnp.dot(
            p.astype(v.dtype), v, preferred_element_type=jnp.float32)
        m_sc[...] = m_new

        @pl.when(kv == pl.num_programs(2) - 1)
        def _finalize():
            inv_l = pl.reciprocal(l_sc[...], approx=approx_recip)   # EUP slot
            x = q.astype(jnp.float32) + acc_sc[...] * inv_l         # residual
            rows = x.shape[0]

            if is_layer_norm:
                # Keep gamma/beta as (1, d_pad): implicit sublane broadcast is
                # effectively free on the VPU, whereas materializing
                # (rows, d_pad) copies adds 2 live f32 tiles to a vreg-heavy
                # epilogue.  Only the .astype is hoisted (LN runs twice).
                gamma = g_ref[...].astype(jnp.float32)
                beta = be_ref[...].astype(jnp.float32)
                if need_d_mask:
                    dmask = (jax.lax.broadcasted_iota(
                        jnp.int32, (1, d_pad), 1) < d_real).astype(jnp.float32)
                else:
                    dmask = None

                def layer_norm(t):
                    mu = jnp.sum(t, axis=-1, keepdims=True) * inv_d
                    tc = t - mu
                    if dmask is not None:
                        tc = tc * dmask          # ignore padded feature lanes
                    var = jnp.sum(tc * tc, axis=-1, keepdims=True) * inv_d
                    return tc * jax.lax.rsqrt(var + ln_eps) * gamma + beta

                x = layer_norm(x)

            # FFN: pre-transposed weights -> plain x @ W.  Chunked along the
            # hidden dim so only a (rows, ffn_chunk) activation is live at a
            # time (bounds spills on v5e/v7x and handles large D).
            w_dtype = w1_ref.dtype
            x_w = x.astype(w_dtype)
            if n_ffn_chunks == 1:
                h = jnp.dot(x_w, w1_ref[...], preferred_element_type=jnp.float32)
                h = jnp.maximum(h + b1_ref[...].astype(jnp.float32), 0.0)
                ffn = jnp.dot(h.astype(w_dtype), w2_ref[...],
                              preferred_element_type=jnp.float32)
            else:
                ffn = jnp.zeros((rows, d_pad), dtype=jnp.float32)
                for c in range(n_ffn_chunks):      # static slices = free views
                    lo, hi = c * ffn_chunk, (c + 1) * ffn_chunk
                    h = jnp.dot(x_w, w1_ref[:, lo:hi],
                                preferred_element_type=jnp.float32)
                    h = jnp.maximum(h + b1_ref[:, lo:hi].astype(jnp.float32), 0.0)
                    ffn = ffn + jnp.dot(h.astype(w_dtype), w2_ref[lo:hi, :],
                                        preferred_element_type=jnp.float32)
            ffn = ffn + b2_ref[...].astype(jnp.float32)

            out = ffn + x
            if is_layer_norm:
                out = layer_norm(out)

            o_ref[0] = out.astype(o_ref.dtype)

    return kernel


def transformer_block(Q, K, V, params, *, is_layer_norm=False,
                      tile_r=None, tile_kv=None,
                      epsilon=1e-8, ln_eps=1e-5, approx_recip=True,
                      compute_dtype=None):
    """Pallas implementation of TransformerBlock.forward.

    Q: (B, Lr, D), K/V: (B, Lu, D).  params = (w1, b1, w2, b2, gamma, beta)
    with PyTorch Linear layout (w: (out, in), y = x @ w.T + b).
    compute_dtype: optionally cast Q/K/V and weights (e.g. jnp.bfloat16) for
    MXU-native inputs on v6e/v7x; softmax/LN/residual math stays f32.
    """
    B, Lr, D = Q.shape
    _, Lu, _ = K.shape
    w1, b1, w2, b2, gamma, beta = params

    # --- Per-generation defaults, VMEM budget, tile choices -----------------
    d_pad = _round_up(D, 128)                       # lane-dense last dim
    def_tr, def_tkv, n_cores, phys_vmem = _tpu_defaults()
    budget = int(phys_vmem * 0.85)                  # leave Mosaic headroom
                                                    # (~54 MiB v7x, ~108 MiB v6e)

    # FFN hidden-dim chunk width (multiple of 128 dividing d_pad, <= 512).
    if d_pad <= 512:
        ffn_chunk = d_pad
    else:
        ffn_chunk = 128
        for c in (512, 384, 256):
            if d_pad % c == 0:
                ffn_chunk = c
                break

    in_isz = jnp.dtype(compute_dtype or Q.dtype).itemsize
    w_isz = jnp.dtype(compute_dtype or w1.dtype).itemsize

    def vmem_est(tr, tkv):
        io = 2 * (2 * tr + 2 * tkv) * d_pad * in_isz        # Q,out,K,V x2 bufs
        wgt = 2 * d_pad * d_pad * w_isz + 6 * d_pad * 4     # single-buffer weights
        scratch = (tr * d_pad + 2 * tr) * 4                 # acc, m, l
        epi = (2 * tr * d_pad + tr * ffn_chunk) * 4         # x, ffn acc, h chunk
        return io + wgt + scratch + epi

    auto_r, auto_kv = tile_r is None, tile_kv is None
    if auto_r:
        tile_r = min(def_tr, _round_up(Lr, 8))
    if auto_kv:
        tile_kv = min(def_tkv, _round_up(Lu, 8))
    # Shrink auto tiles until the estimate fits the per-generation budget.
    while auto_r and tile_r > 128 and vmem_est(tile_r, tile_kv) > budget:
        tile_r //= 2
    while auto_kv and tile_kv > 128 and vmem_est(tile_r, tile_kv) > budget:
        tile_kv //= 2
    # v7x: keep >= num_tensorcores parallel grid steps so no TC sits idle.
    if auto_r and n_cores > 1:
        while tile_r > 8 and B * _cdiv(Lr, tile_r) < n_cores:
            tile_r = max(8, _round_up(tile_r // 2, 8))
    assert tile_r % 8 == 0 and tile_kv % 8 == 0

    lr_pad = _round_up(Lr, tile_r)
    lu_pad = _round_up(Lu, tile_kv)

    # --- Operand prep (pad/cast only when needed) ----------------------------
    def maybe_cast(x):
        return x.astype(compute_dtype) if (compute_dtype is not None and
                                           x.dtype != compute_dtype) else x

    def pad3(x, l, dd):
        if x.shape[1] == l and x.shape[2] == dd:
            return x
        return jnp.pad(x, ((0, 0), (0, l - x.shape[1]), (0, dd - x.shape[2])))

    def pad2(x, r, c):
        if x.shape == (r, c):
            return x
        return jnp.pad(x, ((0, r - x.shape[0]), (0, c - x.shape[1])))

    qp = pad3(maybe_cast(Q), lr_pad, d_pad)
    kp = pad3(maybe_cast(K), lu_pad, d_pad)
    vp = pad3(maybe_cast(V), lu_pad, d_pad)
    # Pre-transpose Linear weights ONCE outside the kernel (PyTorch Linear is
    # x @ W.T); zero padding keeps padded feature lanes identically zero.
    w1t = pad2(maybe_cast(jnp.transpose(w1)), d_pad, d_pad)
    w2t = pad2(maybe_cast(jnp.transpose(w2)), d_pad, d_pad)
    b1p = pad2(b1, 1, d_pad)
    b2p = pad2(b2, 1, d_pad)
    gp = pad2(gamma, 1, d_pad)      # gamma/beta zero-padded on purpose
    bp = pad2(beta, 1, d_pad)

    scale = 1.0 / (math.sqrt(max(1.0, float(D))) + epsilon)
    kernel = _make_kernel(is_layer_norm=is_layer_norm, scale=scale, d_real=D,
                          d_pad=d_pad, lu_real=Lu, lu_pad=lu_pad,
                          tile_kv=tile_kv, ffn_chunk=ffn_chunk,
                          ln_eps=ln_eps, approx_recip=approx_recip)

    grid = (B, lr_pad // tile_r, lu_pad // tile_kv)
    qo_map = lambda b, r, k: (b, r, 0)
    kv_map = lambda b, r, k: (b, k, 0)
    const2 = lambda b, r, k: (0, 0)

    est = vmem_est(tile_r, tile_kv)
    vmem_limit = int(min(max(2 * est, 32 * 2 ** 20), budget))

    def _run(single_buffer_consts):
        # Constant-index operands gain nothing from double buffering; request
        # a single buffer to halve resident weight VMEM.
        def const_spec(shape):
            if single_buffer_consts:
                return pl.BlockSpec(shape, const2, pipeline_mode=pl.Buffered(1))
            return pl.BlockSpec(shape, const2)

        return pl.pallas_call(
            kernel,
            out_shape=jax.ShapeDtypeStruct((B, lr_pad, d_pad), Q.dtype),
            grid_spec=pltpu.PrefetchScalarGridSpec(
                num_scalar_prefetch=0,
                grid=grid,
                in_specs=[
                    pl.BlockSpec((1, tile_r, d_pad), qo_map),    # Q
                    pl.BlockSpec((1, tile_kv, d_pad), kv_map),   # K
                    pl.BlockSpec((1, tile_kv, d_pad), kv_map),   # V
                    const_spec((d_pad, d_pad)),                  # W1^T (resident)
                    const_spec((1, d_pad)),                      # b1
                    const_spec((d_pad, d_pad)),                  # W2^T (resident)
                    const_spec((1, d_pad)),                      # b2
                    const_spec((1, d_pad)),                      # LN gamma
                    const_spec((1, d_pad)),                      # LN beta
                ],
                out_specs=pl.BlockSpec((1, tile_r, d_pad), qo_map),
                scratch_shapes=[
                    pltpu.VMEM((tile_r, 1), jnp.float32),        # running max m
                    pltpu.VMEM((tile_r, 1), jnp.float32),        # running sum l
                    pltpu.VMEM((tile_r, d_pad), jnp.float32),    # PV accumulator
                ],
            ),
            compiler_params=pltpu.CompilerParams(
                dimension_semantics=("parallel", "parallel", "arbitrary"),
                vmem_limit_bytes=vmem_limit,
            ),
        )(qp, kp, vp, w1t, b1p, w2t, b2p, gp, bp)

    try:
        out = _run(True)
    except Exception:
        # Fallback if this Pallas build rejects Buffered(1) on pallas_call specs.
        out = _run(False)

    if lr_pad != Lr or d_pad != D:
        out = out[:, :Lr, :D]
    return out


def init_params(key, D):
    """Parameter init matching the PyTorch module's shapes.
    linear weights: xavier_normal; biases: PyTorch default uniform; LN: 1/0."""
    k1, k2, k3, k4 = jax.random.split(key, 4)
    std = math.sqrt(2.0 / (D + D))
    bound = 1.0 / math.sqrt(D)
    w1 = std * jax.random.normal(k1, (D, D), jnp.float32)
    w2 = std * jax.random.normal(k2, (D, D), jnp.float32)
    b1 = jax.random.uniform(k3, (1, D), jnp.float32, -bound, bound)
    b2 = jax.random.uniform(k4, (1, D), jnp.float32, -bound, bound)
    gamma = jnp.ones((1, D), jnp.float32)
    beta = jnp.zeros((1, D), jnp.float32)
    return (w1, b1, w2, b2, gamma, beta)


def _reference(Q, K, V, params, *, is_layer_norm=False, epsilon=1e-8, ln_eps=1e-5):
    w1, b1, w2, b2, gamma, beta = params
    D = Q.shape[-1]
    scale = 1.0 / (math.sqrt(max(1.0, float(D))) + epsilon)
    scores = jnp.einsum("brd,bud->bru", Q, K) * scale
    p = jax.nn.softmax(scores, axis=-1)
    v_att = jnp.einsum("bru,bud->brd", p, V)
    x = Q + v_att

    def ln(t):
        mu = jnp.mean(t, axis=-1, keepdims=True)
        var = jnp.mean((t - mu) ** 2, axis=-1, keepdims=True)
        return (t - mu) * jax.lax.rsqrt(var + ln_eps) * gamma + beta

    if is_layer_norm:
        x = ln(x)
    h = jnp.maximum(x @ w1.T + b1, 0.0)
    out = (h @ w2.T + b2) + x
    if is_layer_norm:
        out = ln(out)
    return out


if __name__ == "__main__":
    # Small, deliberately non-aligned shapes to exercise padding, the KV mask
    # and multiple online-softmax steps (tile_r/tile_kv forced to 8).
    B, Lr, Lu, D = 2, 12, 20, 32
    key = jax.random.PRNGKey(0)
    kq, kk, kvk, kp = jax.random.split(key, 4)
    Q = jax.random.normal(kq, (B, Lr, D), jnp.float32)
    K = jax.random.normal(kk, (B, Lu, D), jnp.float32)
    V = jax.random.normal(kvk, (B, Lu, D), jnp.float32)
    params = init_params(kp, D)

    for is_ln in (False, True):
        out = transformer_block(Q, K, V, params, is_layer_norm=is_ln,
                                tile_r=8, tile_kv=8)
        out = jax.block_until_ready(out)
        ref = _reference(Q, K, V, params, is_layer_norm=is_ln)
        assert out.shape == (B, Lr, D)
        assert jnp.allclose(out, ref, atol=1e-2, rtol=1e-2), \
            f"mismatch vs reference (is_layer_norm={is_ln})"

    # Auto (device-default) tiling path.
    out = transformer_block(Q, K, V, params, is_layer_norm=False)
    out = jax.block_until_ready(out)
    ref = _reference(Q, K, V, params, is_layer_norm=False)
    assert jnp.allclose(out, ref, atol=1e-2, rtol=1e-2), "mismatch (auto tiles)"

    # bf16 compute path (MXU-native on v6e/v7x): smoke test only.
    out_bf16 = transformer_block(Q, K, V, params, is_layer_norm=True,
                                 compute_dtype=jnp.bfloat16)
    out_bf16 = jax.block_until_ready(out_bf16)
    assert out_bf16.shape == (B, Lr, D)
    assert bool(jnp.isfinite(out_bf16.astype(jnp.float32)).all())

    print("KERNEL_OK")
</pallas_src>

<mosaic_0001>
module attributes {stable_mosaic.version = 11 : i64} {
  func.func @kernel(%arg0: i32, %arg1: i32, %arg2: i32, %arg3: memref<1x8x128xf32, #tpu.memory_space<vmem>>, %arg4: memref<1x8x128xf32, #tpu.memory_space<vmem>>, %arg5: memref<1x8x128xf32, #tpu.memory_space<vmem>>, %arg6: memref<128x128xf32, #tpu.memory_space<vmem>>, %arg7: memref<1x128xf32, #tpu.memory_space<vmem>>, %arg8: memref<128x128xf32, #tpu.memory_space<vmem>>, %arg9: memref<1x128xf32, #tpu.memory_space<vmem>>, %arg10: memref<1x128xf32, #tpu.memory_space<vmem>>, %arg11: memref<1x128xf32, #tpu.memory_space<vmem>>, %arg12: memref<1x8x128xf32, #tpu.memory_space<vmem>>, %arg13: memref<8x1xf32, #tpu.memory_space<vmem>>, %arg14: memref<8x1xf32, #tpu.memory_space<vmem>>, %arg15: memref<8x128xf32, #tpu.memory_space<vmem>>) attributes {dimension_semantics = [#tpu.dimension_semantics<parallel>, #tpu.dimension_semantics<parallel>, #tpu.dimension_semantics<arbitrary>], iteration_bounds = array<i64: 2, 2, 3>, scalar_prefetch = 0 : i64, scratch_operands = 3 : i64, tpu.core_type = #tpu.core_type<tc>, window_params = [{transform_indices = @transform_0, window_bounds = array<i64: 1, 8, 128>}, {transform_indices = @transform_1, window_bounds = array<i64: 1, 8, 128>}, {transform_indices = @transform_2, window_bounds = array<i64: 1, 8, 128>}, {pipeline_mode = #tpu.pipeline_mode<synchronous>, transform_indices = @transform_3, window_bounds = array<i64: 128, 128>}, {pipeline_mode = #tpu.pipeline_mode<synchronous>, transform_indices = @transform_4, window_bounds = array<i64: 1, 128>}, {pipeline_mode = #tpu.pipeline_mode<synchronous>, transform_indices = @transform_5, window_bounds = array<i64: 128, 128>}, {pipeline_mode = #tpu.pipeline_mode<synchronous>, transform_indices = @transform_6, window_bounds = array<i64: 1, 128>}, {pipeline_mode = #tpu.pipeline_mode<synchronous>, transform_indices = @transform_7, window_bounds = array<i64: 1, 128>}, {pipeline_mode = #tpu.pipeline_mode<synchronous>, transform_indices = @transform_8, window_bounds = array<i64: 1, 128>}, {transform_indices = @transform_9, window_bounds = array<i64: 1, 8, 128>}]} {
    %c0_i32 = arith.constant 0 : i32
    %0 = arith.cmpi eq, %arg2, %c0_i32 : i32
    %1 = arith.extui %0 : i1 to i32
    %c0_i32_0 = arith.constant 0 : i32
    %2 = arith.cmpi ne, %1, %c0_i32_0 : i32
    scf.if %2 {
      %cst_27 = arith.constant 0xFF800000 : f32
      %45 = vector.broadcast %cst_27 : f32 to vector<8x1xf32>
      %c0_28 = arith.constant 0 : index
      %c0_29 = arith.constant 0 : index
      %46 = vector.load %arg13[%c0_28, %c0_29] : memref<8x1xf32, #tpu.memory_space<vmem>>, vector<8x1xf32>
      tpu.vector_store %arg13[%c0_28, %c0_29], %45 {strides = array<i32>} : memref<8x1xf32, #tpu.memory_space<vmem>>, vector<8x1xf32>,
      %cst_30 = arith.constant 0.000000e+00 : f32
      %47 = vector.broadcast %cst_30 : f32 to vector<8x1xf32>
      %c0_31 = arith.constant 0 : index
      %c0_32 = arith.constant 0 : index
      %48 = vector.load %arg14[%c0_31, %c0_32] : memref<8x1xf32, #tpu.memory_space<vmem>>, vector<8x1xf32>
      tpu.vector_store %arg14[%c0_31, %c0_32], %47 {strides = array<i32>} : memref<8x1xf32, #tpu.memory_space<vmem>>, vector<8x1xf32>,
      %cst_33 = arith.constant 0.000000e+00 : f32
      %49 = vector.broadcast %cst_33 : f32 to vector<8x128xf32>
      %c0_34 = arith.constant 0 : index
      %c0_35 = arith.constant 0 : index
      %50 = vector.load %arg15[%c0_34, %c0_35] : memref<8x128xf32, #tpu.memory_space<vmem>>, vector<8x128xf32>
      tpu.vector_store %arg15[%c0_34, %c0_35], %49 {strides = array<i32>} : memref<8x128xf32, #tpu.memory_space<vmem>>, vector<8x128xf32>,
    } else {
    }
    %c0 = arith.constant 0 : index
    %c0_1 = arith.constant 0 : index
    %c0_2 = arith.constant 0 : index
    %3 = vector.load %arg3[%c0, %c0_1, %c0_2] : memref<1x8x128xf32, #tpu.memory_space<vmem>>, vector<1x8x128xf32>
    %4 = vector.shape_cast %3 : vector<1x8x128xf32> to vector<8x128xf32>
    %c0_3 = arith.constant 0 : index
    %c0_4 = arith.constant 0 : index
    %c0_5 = arith.constant 0 : index
    %5 = vector.load %arg4[%c0_3, %c0_4, %c0_5] : memref<1x8x128xf32, #tpu.memory_space<vmem>>, vector<1x8x128xf32>
    %6 = vector.shape_cast %5 : vector<1x8x128xf32> to vector<8x128xf32>
    %c0_6 = arith.constant 0 : index
    %c0_7 = arith.constant 0 : index
    %c0_8 = arith.constant 0 : index
    %7 = vector.load %arg5[%c0_6, %c0_7, %c0_8] : memref<1x8x128xf32, #tpu.memory_space<vmem>>, vector<1x8x128xf32>
    %8 = vector.shape_cast %7 : vector<1x8x128xf32> to vector<8x128xf32>
    %cst = arith.constant dense<0.000000e+00> : vector<8x8xf32>
    %9 = tpu.matmul %4, %6, %cst {dimension_numbers = #tpu.dot_dimension_numbers<[1], [1], [0], [0], [0, 0, 1, 0], [], []>} : vector<8x128xf32>, vector<8x128xf32>, vector<8x8xf32> -> vector<8x8xf32>
    %cst_9 = arith.constant 0.176776692 : f32
    %10 = vector.broadcast %cst_9 : f32 to vector<8x8xf32>
    %11 = arith.mulf %9, %10 : vector<8x8xf32>
    %12 = tpu.iota {dimensions = array<i32: 1>} : vector<8x8xi32>
    %c8_i32 = arith.constant 8 : i32
    %13 = arith.muli %arg2, %c8_i32 : i32
    %14 = vector.broadcast %13 : i32 to vector<8x8xi32>
    %15 = arith.addi %12, %14 : vector<8x8xi32>
    %c20_i32 = arith.constant 20 : i32
    %16 = vector.broadcast %c20_i32 : i32 to vector<8x8xi32>
    %17 = arith.cmpi slt, %15, %16 : vector<8x8xi32>
    %cst_10 = arith.constant -1.000000e+30 : f32
    %18 = vector.broadcast %cst_10 : f32 to vector<8x8xf32>
    %19 = arith.select %17, %11, %18 : vector<8x8xi1>, vector<8x8xf32>
    %c0_11 = arith.constant 0 : index
    %c0_12 = arith.constant 0 : index
    %20 = vector.load %arg13[%c0_11, %c0_12] : memref<8x1xf32, #tpu.memory_space<vmem>>, vector<8x1xf32>
    %cst_13 = arith.constant dense<0xFF800000> : vector<8xf32>
    %21 = vector.multi_reduction <maximumf>, %19, %cst_13 [1] : vector<8x8xf32> to vector<8xf32>
    %22 = vector.shape_cast %21 : vector<8xf32> to vector<8x1xf32>
    %23 = arith.maximumf %20, %22 : vector<8x1xf32>
    %24 = arith.subf %20, %23 : vector<8x1xf32>
    %25 = math.exp %24 : vector<8x1xf32>
    %26 = vector.broadcast %23 : vector<8x1xf32> to vector<8x8xf32>
    %27 = arith.subf %19, %26 : vector<8x8xf32>
    %28 = math.exp %27 : vector<8x8xf32>
    %c0_14 = arith.constant 0 : index
    %c0_15 = arith.constant 0 : index
    %29 = vector.load %arg14[%c0_14, %c0_15] : memref<8x1xf32, #tpu.memory_space<vmem>>, vector<8x1xf32>
    %30 = arith.mulf %25, %29 : vector<8x1xf32>
    %cst_16 = arith.constant dense<0.000000e+00> : vector<8xf32>
    %31 = vector.multi_reduction <add>, %28, %cst_16 [1] : vector<8x8xf32> to vector<8xf32>
    %32 = vector.shape_cast %31 : vector<8xf32> to vector<8x1xf32>
    %33 = arith.addf %30, %32 : vector<8x1xf32>
    %c0_17 = arith.constant 0 : index
    %c0_18 = arith.constant 0 : index
    %34 = vector.load %arg14[%c0_17, %c0_18] : memref<8x1xf32, #tpu.memory_space<vmem>>, vector<8x1xf32>
    tpu.vector_store %arg14[%c0_17, %c0_18], %33 {strides = array<i32>} : memref<8x1xf32, #tpu.memory_space<vmem>>, vector<8x1xf32>,
    %c0_19 = arith.constant 0 : index
    %c0_20 = arith.constant 0 : index
    %35 = vector.load %arg15[%c0_19, %c0_20] : memref<8x128xf32, #tpu.memory_space<vmem>>, vector<8x128xf32>
    %36 = vector.broadcast %25 : vector<8x1xf32> to vector<8x128xf32>
    %37 = arith.mulf %36, %35 : vector<8x128xf32>
    %cst_21 = arith.constant dense<0.000000e+00> : vector<8x128xf32>
    %38 = tpu.matmul %28, %8, %cst_21 {dimension_numbers = #tpu.dot_dimension_numbers<[1], [0], [0], [1], [0, 0, 1, 1], [], []>} : vector<8x8xf32>, vector<8x128xf32>, vector<8x128xf32> -> vector<8x128xf32>
    %39 = arith.addf %37, %38 : vector<8x128xf32>
    %c0_22 = arith.constant 0 : index
    %c0_23 = arith.constant 0 : index
    %40 = vector.load %arg15[%c0_22, %c0_23] : memref<8x128xf32, #tpu.memory_space<vmem>>, vector<8x128xf32>
    tpu.vector_store %arg15[%c0_22, %c0_23], %39 {strides = array<i32>} : memref<8x128xf32, #tpu.memory_space<vmem>>, vector<8x128xf32>,
    %c0_24 = arith.constant 0 : index
    %c0_25 = arith.constant 0 : index
    %41 = vector.load %arg13[%c0_24, %c0_25] : memref<8x1xf32, #tpu.memory_space<vmem>>, vector<8x1xf32>
    tpu.vector_store %arg13[%c0_24, %c0_25], %23 {strides = array<i32>} : memref<8x1xf32, #tpu.memory_space<vmem>>, vector<8x1xf32>,
    %c2_i32 = arith.constant 2 : i32
    %42 = arith.cmpi eq, %arg2, %c2_i32 : i32
    %43 = arith.extui %42 : i1 to i32
    %c0_i32_26 = arith.constant 0 : i32
    %44 = arith.cmpi ne, %43, %c0_i32_26 : i32
    scf.if %44 {
      %c0_27 = arith.constant 0 : index
      %c0_28 = arith.constant 0 : index
      %45 = vector.load %arg14[%c0_27, %c0_28] : memref<8x1xf32, #tpu.memory_space<vmem>>, vector<8x1xf32>
      %46 = tpu.reciprocal %45 {approx = true} : vector<8x1xf32> -> vector<8x1xf32>
      %c0_29 = arith.constant 0 : index
      %c0_30 = arith.constant 0 : index
      %47 = vector.load %arg15[%c0_29, %c0_30] : memref<8x128xf32, #tpu.memory_space<vmem>>, vector<8x128xf32>
      %48 = vector.broadcast %46 : vector<8x1xf32> to vector<8x128xf32>
      %49 = arith.mulf %47, %48 : vector<8x128xf32>
      %50 = arith.addf %4, %49 : vector<8x128xf32>
      %c0_31 = arith.constant 0 : index
      %c0_32 = arith.constant 0 : index
      %51 = vector.load %arg6[%c0_31, %c0_32] : memref<128x128xf32, #tpu.memory_space<vmem>>, vector<128x128xf32>
      %cst_33 = arith.constant dense<0.000000e+00> : vector<8x128xf32>
      %52 = tpu.matmul %50, %51, %cst_33 {dimension_numbers = #tpu.dot_dimension_numbers<[1], [0], [0], [1], [0, 0, 1, 1], [], []>} : vector<8x128xf32>, vector<128x128xf32>, vector<8x128xf32> -> vector<8x128xf32>
      %c0_34 = arith.constant 0 : index
      %c0_35 = arith.constant 0 : index
      %53 = vector.load %arg7[%c0_34, %c0_35] : memref<1x128xf32, #tpu.memory_space<vmem>>, vector<1x128xf32>
      %54 = vector.broadcast %53 : vector<1x128xf32> to vector<8x128xf32>
      %55 = arith.addf %52, %54 : vector<8x128xf32>
      %cst_36 = arith.constant 0.000000e+00 : f32
      %56 = vector.broadcast %cst_36 : f32 to vector<8x128xf32>
      %57 = arith.maximumf %55, %56 : vector<8x128xf32>
      %c0_37 = arith.constant 0 : index
      %c0_38 = arith.constant 0 : index
      %58 = vector.load %arg8[%c0_37, %c0_38] : memref<128x128xf32, #tpu.memory_space<vmem>>, vector<128x128xf32>
      %cst_39 = arith.constant dense<0.000000e+00> : vector<8x128xf32>
      %59 = tpu.matmul %57, %58, %cst_39 {dimension_numbers = #tpu.dot_dimension_numbers<[1], [0], [0], [1], [0, 0, 1, 1], [], []>} : vector<8x128xf32>, vector<128x128xf32>, vector<8x128xf32> -> vector<8x128xf32>
      %c0_40 = arith.constant 0 : index
      %c0_41 = arith.constant 0 : index
      %60 = vector.load %arg9[%c0_40, %c0_41] : memref<1x128xf32, #tpu.memory_space<vmem>>, vector<1x128xf32>
      %61 = vector.broadcast %60 : vector<1x128xf32> to vector<8x128xf32>
      %62 = arith.addf %59, %61 : vector<8x128xf32>
      %63 = arith.addf %62, %50 : vector<8x128xf32>
      %c0_42 = arith.constant 0 : index
      %c0_43 = arith.constant 0 : index
      %c0_44 = arith.constant 0 : index
      %64 = vector.load %arg12[%c0_42, %c0_43, %c0_44] : memref<1x8x128xf32, #tpu.memory_space<vmem>>, vector<1x8x128xf32>
      %65 = vector.shape_cast %64 : vector<1x8x128xf32> to vector<8x128xf32>
      %66 = vector.shape_cast %63 : vector<8x128xf32> to vector<1x8x128xf32>
      tpu.vector_store %arg12[%c0_42, %c0_43, %c0_44], %66 {strides = array<i32>} : memref<1x8x128xf32, #tpu.memory_space<vmem>>, vector<1x8x128xf32>,
    } else {
    }
    return
  }
  func.func @transform_0(%arg0: i32, %arg1: i32, %arg2: i32) -> (i32, i32, i32) {
    %c0_i32 = arith.constant 0 : i32
    %c0_i32_0 = arith.constant 0 : i32
    return %arg0, %arg1, %c0_i32 : i32, i32, i32
  }
  func.func @transform_1(%arg0: i32, %arg1: i32, %arg2: i32) -> (i32, i32, i32) {
    %c0_i32 = arith.constant 0 : i32
    %c0_i32_0 = arith.constant 0 : i32
    return %arg0, %arg2, %c0_i32 : i32, i32, i32
  }
  func.func @transform_2(%arg0: i32, %arg1: i32, %arg2: i32) -> (i32, i32, i32) {
    %c0_i32 = arith.constant 0 : i32
    %c0_i32_0 = arith.constant 0 : i32
    return %arg0, %arg2, %c0_i32 : i32, i32, i32
  }
  func.func @transform_3(%arg0: i32, %arg1: i32, %arg2: i32) -> (i32, i32) {
    %c0_i32 = arith.constant 0 : i32
    %c0_i32_0 = arith.constant 0 : i32
    %c0_i32_1 = arith.constant 0 : i32
    return %c0_i32, %c0_i32_0 : i32, i32
  }
  func.func @transform_4(%arg0: i32, %arg1: i32, %arg2: i32) -> (i32, i32) {
    %c0_i32 = arith.constant 0 : i32
    %c0_i32_0 = arith.constant 0 : i32
    %c0_i32_1 = arith.constant 0 : i32
    return %c0_i32, %c0_i32_0 : i32, i32
  }
  func.func @transform_5(%arg0: i32, %arg1: i32, %arg2: i32) -> (i32, i32) {
    %c0_i32 = arith.constant 0 : i32
    %c0_i32_0 = arith.constant 0 : i32
    %c0_i32_1 = arith.constant 0 : i32
    return %c0_i32, %c0_i32_0 : i32, i32
  }
  func.func @transform_6(%arg0: i32, %arg1: i32, %arg2: i32) -> (i32, i32) {
    %c0_i32 = arith.constant 0 : i32
    %c0_i32_0 = arith.constant 0 : i32
    %c0_i32_1 = arith.constant 0 : i32
    return %c0_i32, %c0_i32_0 : i32, i32
  }
  func.func @transform_7(%arg0: i32, %arg1: i32, %arg2: i32) -> (i32, i32) {
    %c0_i32 = arith.constant 0 : i32
    %c0_i32_0 = arith.constant 0 : i32
    %c0_i32_1 = arith.constant 0 : i32
    return %c0_i32, %c0_i32_0 : i32, i32
  }
  func.func @transform_8(%arg0: i32, %arg1: i32, %arg2: i32) -> (i32, i32) {
    %c0_i32 = arith.constant 0 : i32
    %c0_i32_0 = arith.constant 0 : i32
    %c0_i32_1 = arith.constant 0 : i32
    return %c0_i32, %c0_i32_0 : i32, i32
  }
  func.func @transform_9(%arg0: i32, %arg1: i32, %arg2: i32) -> (i32, i32, i32) {
    %c0_i32 = arith.constant 0 : i32
    %c0_i32_0 = arith.constant 0 : i32
    return %arg0, %arg1, %c0_i32 : i32, i32, i32
  }
}

module attributes {stable_mosaic.version = 11 : i64} {
  func.func @kernel(%arg0: i32, %arg1: i32, %arg2: i32, %arg3: memref<1x8x128xf32, #tpu.memory_space<vmem>>, %arg4: memref<1x8x128xf32, #tpu.memory_space<vmem>>, %arg5: memref<1x8x128xf32, #tpu.memory_space<vmem>>, %arg6: memref<128x128xf32, #tpu.memory_space<vmem>>, %arg7: memref<1x128xf32, #tpu.memory_space<vmem>>, %arg8: memref<128x128xf32, #tpu.memory_space<vmem>>, %arg9: memref<1x128xf32, #tpu.memory_space<vmem>>, %arg10: memref<1x128xf32, #tpu.memory_space<vmem>>, %arg11: memref<1x128xf32, #tpu.memory_space<vmem>>, %arg12: memref<1x8x128xf32, #tpu.memory_space<vmem>>, %arg13: memref<8x1xf32, #tpu.memory_space<vmem>>, %arg14: memref<8x1xf32, #tpu.memory_space<vmem>>, %arg15: memref<8x128xf32, #tpu.memory_space<vmem>>) attributes {dimension_semantics = [#tpu.dimension_semantics<parallel>, #tpu.dimension_semantics<parallel>, #tpu.dimension_semantics<arbitrary>], iteration_bounds = array<i64: 2, 2, 3>, scalar_prefetch = 0 : i64, scratch_operands = 3 : i64, tpu.core_type = #tpu.core_type<tc>, window_params = [{transform_indices = @transform_0, window_bounds = array<i64: 1, 8, 128>}, {transform_indices = @transform_1, window_bounds = array<i64: 1, 8, 128>}, {transform_indices = @transform_2, window_bounds = array<i64: 1, 8, 128>}, {pipeline_mode = #tpu.pipeline_mode<synchronous>, transform_indices = @transform_3, window_bounds = array<i64: 128, 128>}, {pipeline_mode = #tpu.pipeline_mode<synchronous>, transform_indices = @transform_4, window_bounds = array<i64: 1, 128>}, {pipeline_mode = #tpu.pipeline_mode<synchronous>, transform_indices = @transform_5, window_bounds = array<i64: 128, 128>}, {pipeline_mode = #tpu.pipeline_mode<synchronous>, transform_indices = @transform_6, window_bounds = array<i64: 1, 128>}, {pipeline_mode = #tpu.pipeline_mode<synchronous>, transform_indices = @transform_7, window_bounds = array<i64: 1, 128>}, {pipeline_mode = #tpu.pipeline_mode<synchronous>, transform_indices = @transform_8, window_bounds = array<i64: 1, 128>}, {transform_indices = @transform_9, window_bounds = array<i64: 1, 8, 128>}]} {
    %c0_i32 = arith.constant 0 : i32
    %0 = arith.cmpi eq, %arg2, %c0_i32 : i32
    %1 = arith.extui %0 : i1 to i32
    %c0_i32_0 = arith.constant 0 : i32
    %2 = arith.cmpi ne, %1, %c0_i32_0 : i32
    scf.if %2 {
      %cst_27 = arith.constant 0xFF800000 : f32
      %45 = vector.broadcast %cst_27 : f32 to vector<8x1xf32>
      %c0_28 = arith.constant 0 : index
      %c0_29 = arith.constant 0 : index
      %46 = vector.load %arg13[%c0_28, %c0_29] : memref<8x1xf32, #tpu.memory_space<vmem>>, vector<8x1xf32>
      tpu.vector_store %arg13[%c0_28, %c0_29], %45 {strides = array<i32>} : memref<8x1xf32, #tpu.memory_space<vmem>>, vector<8x1xf32>,
      %cst_30 = arith.constant 0.000000e+00 : f32
      %47 = vector.broadcast %cst_30 : f32 to vector<8x1xf32>
      %c0_31 = arith.constant 0 : index
      %c0_32 = arith.constant 0 : index
      %48 = vector.load %arg14[%c0_31, %c0_32] : memref<8x1xf32, #tpu.memory_space<vmem>>, vector<8x1xf32>
      tpu.vector_store %arg14[%c0_31, %c0_32], %47 {strides = array<i32>} : memref<8x1xf32, #tpu.memory_space<vmem>>, vector<8x1xf32>,
      %cst_33 = arith.constant 0.000000e+00 : f32
      %49 = vector.broadcast %cst_33 : f32 to vector<8x128xf32>
      %c0_34 = arith.constant 0 : index
      %c0_35 = arith.constant 0 : index
      %50 = vector.load %arg15[%c0_34, %c0_35] : memref<8x128xf32, #tpu.memory_space<vmem>>, vector<8x128xf32>
      tpu.vector_store %arg15[%c0_34, %c0_35], %49 {strides = array<i32>} : memref<8x128xf32, #tpu.memory_space<vmem>>, vector<8x128xf32>,
    } else {
    }
    %c0 = arith.constant 0 : index
    %c0_1 = arith.constant 0 : index
    %c0_2 = arith.constant 0 : index
    %3 = vector.load %arg3[%c0, %c0_1, %c0_2] : memref<1x8x128xf32, #tpu.memory_space<vmem>>, vector<1x8x128xf32>
    %4 = vector.shape_cast %3 : vector<1x8x128xf32> to vector<8x128xf32>
    %c0_3 = arith.constant 0 : index
    %c0_4 = arith.constant 0 : index
    %c0_5 = arith.constant 0 : index
    %5 = vector.load %arg4[%c0_3, %c0_4, %c0_5] : memref<1x8x128xf32, #tpu.memory_space<vmem>>, vector<1x8x128xf32>
    %6 = vector.shape_cast %5 : vector<1x8x128xf32> to vector<8x128xf32>
    %c0_6 = arith.constant 0 : index
    %c0_7 = arith.constant 0 : index
    %c0_8 = arith.constant 0 : index
    %7 = vector.load %arg5[%c0_6, %c0_7, %c0_8] : memref<1x8x128xf32, #tpu.memory_space<vmem>>, vector<1x8x128xf32>
    %8 = vector.shape_cast %7 : vector<1x8x128xf32> to vector<8x128xf32>
    %cst = arith.constant dense<0.000000e+00> : vector<8x8xf32>
    %9 = tpu.matmul %4, %6, %cst {dimension_numbers = #tpu.dot_dimension_numbers<[1], [1], [0], [0], [0, 0, 1, 0], [], []>} : vector<8x128xf32>, vector<8x128xf32>, vector<8x8xf32> -> vector<8x8xf32>
    %cst_9 = arith.constant 0.176776692 : f32
    %10 = vector.broadcast %cst_9 : f32 to vector<8x8xf32>
    %11 = arith.mulf %9, %10 : vector<8x8xf32>
    %12 = tpu.iota {dimensions = array<i32: 1>} : vector<8x8xi32>
    %c8_i32 = arith.constant 8 : i32
    %13 = arith.muli %arg2, %c8_i32 : i32
    %14 = vector.broadcast %13 : i32 to vector<8x8xi32>
    %15 = arith.addi %12, %14 : vector<8x8xi32>
    %c20_i32 = arith.constant 20 : i32
    %16 = vector.broadcast %c20_i32 : i32 to vector<8x8xi32>
    %17 = arith.cmpi slt, %15, %16 : vector<8x8xi32>
    %cst_10 = arith.constant -1.000000e+30 : f32
    %18 = vector.broadcast %cst_10 : f32 to vector<8x8xf32>
    %19 = arith.select %17, %11, %18 : vector<8x8xi1>, vector<8x8xf32>
    %c0_11 = arith.constant 0 : index
    %c0_12 = arith.constant 0 : index
    %20 = vector.load %arg13[%c0_11, %c0_12] : memref<8x1xf32, #tpu.memory_space<vmem>>, vector<8x1xf32>
    %cst_13 = arith.constant dense<0xFF800000> : vector<8xf32>
    %21 = vector.multi_reduction <maximumf>, %19, %cst_13 [1] : vector<8x8xf32> to vector<8xf32>
    %22 = vector.shape_cast %21 : vector<8xf32> to vector<8x1xf32>
    %23 = arith.maximumf %20, %22 : vector<8x1xf32>
    %24 = arith.subf %20, %23 : vector<8x1xf32>
    %25 = math.exp %24 : vector<8x1xf32>
    %26 = vector.broadcast %23 : vector<8x1xf32> to vector<8x8xf32>
    %27 = arith.subf %19, %26 : vector<8x8xf32>
    %28 = math.exp %27 : vector<8x8xf32>
    %c0_14 = arith.constant 0 : index
    %c0_15 = arith.constant 0 : index
    %29 = vector.load %arg14[%c0_14, %c0_15] : memref<8x1xf32, #tpu.memory_space<vmem>>, vector<8x1xf32>
    %30 = arith.mulf %25, %29 : vector<8x1xf32>
    %cst_16 = arith.constant dense<0.000000e+00> : vector<8xf32>
    %31 = vector.multi_reduction <add>, %28, %cst_16 [1] : vector<8x8xf32> to vector<8xf32>
    %32 = vector.shape_cast %31 : vector<8xf32> to vector<8x1xf32>
    %33 = arith.addf %30, %32 : vector<8x1xf32>
    %c0_17 = arith.constant 0 : index
    %c0_18 = arith.constant 0 : index
    %34 = vector.load %arg14[%c0_17, %c0_18] : memref<8x1xf32, #tpu.memory_space<vmem>>, vector<8x1xf32>
    tpu.vector_store %arg14[%c0_17, %c0_18], %33 {strides = array<i32>} : memref<8x1xf32, #tpu.memory_space<vmem>>, vector<8x1xf32>,
    %c0_19 = arith.constant 0 : index
    %c0_20 = arith.constant 0 : index
    %35 = vector.load %arg15[%c0_19, %c0_20] : memref<8x128xf32, #tpu.memory_space<vmem>>, vector<8x128xf32>
    %36 = vector.broadcast %25 : vector<8x1xf32> to vector<8x128xf32>
    %37 = arith.mulf %36, %35 : vector<8x128xf32>
    %cst_21 = arith.constant dense<0.000000e+00> : vector<8x128xf32>
    %38 = tpu.matmul %28, %8, %cst_21 {dimension_numbers = #tpu.dot_dimension_numbers<[1], [0], [0], [1], [0, 0, 1, 1], [], []>} : vector<8x8xf32>, vector<8x128xf32>, vector<8x128xf32> -> vector<8x128xf32>
    %39 = arith.addf %37, %38 : vector<8x128xf32>
    %c0_22 = arith.constant 0 : index
    %c0_23 = arith.constant 0 : index
    %40 = vector.load %arg15[%c0_22, %c0_23] : memref<8x128xf32, #tpu.memory_space<vmem>>, vector<8x128xf32>
    tpu.vector_store %arg15[%c0_22, %c0_23], %39 {strides = array<i32>} : memref<8x128xf32, #tpu.memory_space<vmem>>, vector<8x128xf32>,
    %c0_24 = arith.constant 0 : index
    %c0_25 = arith.constant 0 : index
    %41 = vector.load %arg13[%c0_24, %c0_25] : memref<8x1xf32, #tpu.memory_space<vmem>>, vector<8x1xf32>
    tpu.vector_store %arg13[%c0_24, %c0_25], %23 {strides = array<i32>} : memref<8x1xf32, #tpu.memory_space<vmem>>, vector<8x1xf32>,
    %c2_i32 = arith.constant 2 : i32
    %42 = arith.cmpi eq, %arg2, %c2_i32 : i32
    %43 = arith.extui %42 : i1 to i32
    %c0_i32_26 = arith.constant 0 : i32
    %44 = arith.cmpi ne, %43, %c0_i32_26 : i32
    scf.if %44 {
      %c0_27 = arith.constant 0 : index
      %c0_28 = arith.constant 0 : index
      %45 = vector.load %arg14[%c0_27, %c0_28] : memref<8x1xf32, #tpu.memory_space<vmem>>, vector<8x1xf32>
      %46 = tpu.reciprocal %45 {approx = true} : vector<8x1xf32> -> vector<8x1xf32>
      %c0_29 = arith.constant 0 : index
      %c0_30 = arith.constant 0 : index
      %47 = vector.load %arg15[%c0_29, %c0_30] : memref<8x128xf32, #tpu.memory_space<vmem>>, vector<8x128xf32>
      %48 = vector.broadcast %46 : vector<8x1xf32> to vector<8x128xf32>
      %49 = arith.mulf %47, %48 : vector<8x128xf32>
      %50 = arith.addf %4, %49 : vector<8x128xf32>
      %c0_31 = arith.constant 0 : index
      %c0_32 = arith.constant 0 : index
      %51 = vector.load %arg6[%c0_31, %c0_32] : memref<128x128xf32, #tpu.memory_space<vmem>>, vector<128x128xf32>
      %cst_33 = arith.constant dense<0.000000e+00> : vector<8x128xf32>
      %52 = tpu.matmul %50, %51, %cst_33 {dimension_numbers = #tpu.dot_dimension_numbers<[1], [0], [0], [1], [0, 0, 1, 1], [], []>} : vector<8x128xf32>, vector<128x128xf32>, vector<8x128xf32> -> vector<8x128xf32>
      %c0_34 = arith.constant 0 : index
      %c0_35 = arith.constant 0 : index
      %53 = vector.load %arg7[%c0_34, %c0_35] : memref<1x128xf32, #tpu.memory_space<vmem>>, vector<1x128xf32>
      %54 = vector.broadcast %53 : vector<1x128xf32> to vector<8x128xf32>
      %55 = arith.addf %52, %54 : vector<8x128xf32>
      %cst_36 = arith.constant 0.000000e+00 : f32
      %56 = vector.broadcast %cst_36 : f32 to vector<8x128xf32>
      %57 = arith.maximumf %55, %56 : vector<8x128xf32>
      %c0_37 = arith.constant 0 : index
      %c0_38 = arith.constant 0 : index
      %58 = vector.load %arg8[%c0_37, %c0_38] : memref<128x128xf32, #tpu.memory_space<vmem>>, vector<128x128xf32>
      %cst_39 = arith.constant dense<0.000000e+00> : vector<8x128xf32>
      %59 = tpu.matmul %57, %58, %cst_39 {dimension_numbers = #tpu.dot_dimension_numbers<[1], [0], [0], [1], [0, 0, 1, 1], [], []>} : vector<8x128xf32>, vector<128x128xf32>, vector<8x128xf32> -> vector<8x128xf32>
      %c0_40 = arith.constant 0 : index
      %c0_41 = arith.constant 0 : index
      %60 = vector.load %arg9[%c0_40, %c0_41] : memref<1x128xf32, #tpu.memory_space<vmem>>, vector<1x128xf32>
      %61 = vector.broadcast %60 : vector<1x128xf32> to vector<8x128xf32>
      %62 = arith.addf %59, %61 : vector<8x128xf32>
      %63 = arith.addf %62, %50 : vector<8x128xf32>
      %c0_42 = arith.constant 0 : index
      %c0_43 = arith.constant 0 : index
      %c0_44 = arith.constant 0 : index
      %64 = vector.load %arg12[%c0_42, %c0_43, %c0_44] : memref<1x8x128xf32, #tpu.memory_space<vmem>>, vector<1x8x128xf32>
      %65 = vector.shape_cast %64 : vector<1x8x128xf32> to vector<8x128xf32>
      %66 = vector.shape_cast %63 : vector<8x128xf32> to vector<1x8x128xf32>
      tpu.vector_store %arg12[%c0_42, %c0_43, %c0_44], %66 {strides = array<i32>} : memref<1x8x128xf32, #tpu.memory_space<vmem>>, vector<1x8x128xf32>,
    } else {
    }
    return
  }
  func.func @transform_0(%arg0: i32, %arg1: i32, %arg2: i32) -> (i32, i32, i32) {
    %c0_i32 = arith.constant 0 : i32
    %c0_i32_0 = arith.constant 0 : i32
    return %arg0, %arg1, %c0_i32 : i32, i32, i32
  }
  func.func @transform_1(%arg0: i32, %arg1: i32, %arg2: i32) -> (i32, i32, i32) {
    %c0_i32 = arith.constant 0 : i32
    %c0_i32_0 = arith.constant 0 : i32
    return %arg0, %arg2, %c0_i32 : i32, i32, i32
  }
  func.func @transform_2(%arg0: i32, %arg1: i32, %arg2: i32) -> (i32, i32, i32) {
    %c0_i32 = arith.constant 0 : i32
    %c0_i32_0 = arith.constant 0 : i32
    return %arg0, %arg2, %c0_i32 : i32, i32, i32
  }
  func.func @transform_3(%arg0: i32, %arg1: i32, %arg2: i32) -> (i32, i32) {
    %c0_i32 = arith.constant 0 : i32
    %c0_i32_0 = arith.constant 0 : i32
    %c0_i32_1 = arith.constant 0 : i32
    return %c0_i32, %c0_i32_0 : i32, i32
  }
  func.func @transform_4(%arg0: i32, %arg1: i32, %arg2: i32) -> (i32, i32) {
    %c0_i32 = arith.constant 0 : i32
    %c0_i32_0 = arith.constant 0 : i32
    %c0_i32_1 = arith.constant 0 : i32
    return %c0_i32, %c0_i32_0 : i32, i32
  }
  func.func @transform_5(%arg0: i32, %arg1: i32, %arg2: i32) -> (i32, i32) {
    %c0_i32 = arith.constant 0 : i32
    %c0_i32_0 = arith.constant 0 : i32
    %c0_i32_1 = arith.constant 0 : i32
    return %c0_i32, %c0_i32_0 : i32, i32
  }
  func.func @transform_6(%arg0: i32, %arg1: i32, %arg2: i32) -> (i32, i32) {
    %c0_i32 = arith.constant 0 : i32
    %c0_i32_0 = arith.constant 0 : i32
    %c0_i32_1 = arith.constant 0 : i32
    return %c0_i32, %c0_i32_0 : i32, i32
  }
  func.func @transform_7(%arg0: i32, %arg1: i32, %arg2: i32) -> (i32, i32) {
    %c0_i32 = arith.constant 0 : i32
    %c0_i32_0 = arith.constant 0 : i32
    %c0_i32_1 = arith.constant 0 : i32
    return %c0_i32, %c0_i32_0 : i32, i32
  }
  func.func @transform_8(%arg0: i32, %arg1: i32, %arg2: i32) -> (i32, i32) {
    %c0_i32 = arith.constant 0 : i32
    %c0_i32_0 = arith.constant 0 : i32
    %c0_i32_1 = arith.constant 0 : i32
    return %c0_i32, %c0_i32_0 : i32, i32
  }
  func.func @transform_9(%arg0: i32, %arg1: i32, %arg2: i32) -> (i32, i32, i32) {
    %c0_i32 = arith.constant 0 : i32
    %c0_i32_0 = arith.constant 0 : i32
    return %arg0, %arg1, %c0_i32 : i32, i32, i32
  }
}

</mosaic_0001>

<bundles_post_ra>
// kernel: tpu_custom_call.1
= control target key start
LH: loop header
LB: loop body
LE: loop exit
PB: predicated region body
PF: predicated region fallthrough
CT: control target
= control target key end

     0   :  { %s1747_s0 = inlined_call_operand.hbm [shape: f32[2,16,128], index: 0, kind: input, shape index: {}]   ;;  %s1748_s1 = inlined_call_operand.hbm [shape: f32[2,24,128], index: 1, kind: input, shape index: {}]   ;;  %s1749_s2 = inlined_call_operand.hbm [shape: f32[2,24,128], index: 2, kind: input, shape index: {}]   ;;  %s1750_s3 = inlined_call_operand.hbm [shape: f32[128,128], index: 3, kind: input, shape index: {}]   ;;  %s1751_s4 = inlined_call_operand.vmem [shape: f32[1,128], index: 4, kind: input, shape index: {}]   ;;  %s1752_s5 = inlined_call_operand.hbm [shape: f32[128,128], index: 5, kind: input, shape index: {}]   ;;  %s1753_s6 = inlined_call_operand.vmem [shape: f32[1,128], index: 6, kind: input, shape index: {}]   ;;  %s1754_s7 = inlined_call_operand.vmem [shape: f32[1,128], index: 7, kind: input, shape index: {}]   ;;  %s1755_s8 = inlined_call_operand.vmem [shape: f32[1,128], index: 8, kind: input, shape index: {}]   ;;  %s1756_s9 = inlined_call_operand.hbm [shape: f32[2,16,128], index: 9, kind: output, shape index: {}]  }
   0x1   :  { %1775 = sst [smem:[#allocation32_spill]] %s1748_s1 }
   0x2   :  { %1776 = sst [smem:[#allocation33_spill]] %s1749_s2 }
   0x3   :  { %1777 = sst [smem:[#allocation34_spill]] %s1750_s3 }
   0x4   :  { %1778 = sst [smem:[#allocation35_spill]] %s1751_s4 }
   0x5   :  { %1779 = sst [smem:[#allocation36_spill]] %s1752_s5 }
   0x6   :  { %1780 = sst [smem:[#allocation37_spill]] %s1753_s6 }
   0x7   :  { %1781 = sst [smem:[#allocation38_spill]] %s1756_s9 }
   0x8   :  { %14 = vsyncpa [#allocation6], 0 }
   0x9   :  { %16 = vsyncpa [#allocation6 + $0x1], 0 }
   0xa   :  { %17 = vsyncpa [#allocation9], 0 }
   0xb   :  { %19 = vsyncpa [#allocation9 + $0x1], 0 }
   0xc   :  { %20 = vsyncpa [#allocation12], 0 }
   0xd   :  { %21 = vsyncpa [#allocation7], 0 }
   0xe   :  { %23 = vsyncpa [#allocation7 + $0x1], 0  ;;  %s1413_s30 = smov 0   ;;  %s1415_s10 = smov 0  }
   0xf   :  { %s1417_s11 = smov 0   ;;  %s1419_s7 = smov 0  }
  0x10   :  { %s1421_s12 = smov 0   ;;  %s1423_s8 = smov 0  }
  0x11   :  { %s1425_s13 = smov 0   ;;  %s1427_s14 = smov 0  }
  0x12   :  { %s1429_s15 = smov 0   ;;  %s1431_s16 = smov 0  }
  0x13   :  { %s1433_s17 = smov 0   ;;  %s1435_s18 = smov 0  }
  0x14   :  { %s1437_s19 = smov 0  }
  0x15 LB: > { %1782 = sst [smem:[#allocation19_spill]] %s1309_s10  ;;  %s1479_s20 = sadd.s32 4294967295, %s1353_s19   ;;  %s1353_s19 = sphi %s1437_s19, %s29_s19   ;;  %s1349_s18 = sphi %s1435_s18, %s1842_s18   ;;  %s1345_s17 = sphi %s1433_s17, %s1841_s17   ;;  %s1341_s16 = sphi %s1431_s16, %s1840_s16   ;;  %s1337_s15 = sphi %s1429_s15, %s1839_s15   ;;  %s1333_s14 = sphi %s1427_s14, %s1838_s14   ;;  %s1329_s13 = sphi %s1425_s13, %s1837_s13   ;;  %s1325_s8 = sphi %s1423_s8, %s1836_s8   ;;  %s1321_s12 = sphi %s1421_s12, %s1835_s12   ;;  %s1317_s7 = sphi %s1419_s7, %s1834_s7   ;;  %s1313_s11 = sphi %s1417_s11, %s1833_s11   ;;  %s1309_s10 = sphi %s1415_s10, %s1832_s10   ;;  %s1305_s30 = sphi %s1413_s30, %s1829_s30  }
  0x16   : > { %1783 = sst [smem:[#allocation20_spill]] %s1317_s7  ;;  %p862_p0 = scmp.ge.s32.totalorder %s1353_s19, 1 }
  0x17   : > { %1784 = sst [smem:[#allocation21_spill]] %s1329_s13  ;;  %p71_p1 = scmp.eq.s32.totalorder %s1479_s20, 0 }
  0x18   : > { %1785 = sst [smem:[#allocation22_spill]] %s1333_s14  ;;  %p291_p2 = scmp.lt.s32.totalorder %s1353_s19, 13 }
  0x19   : > { %1786 = sst [smem:[#allocation23_spill]] %s1337_s15  ;;  %s1355_s25 = smov [#allocation11]  }
  0x1a   : > { %1787 = sst [smem:[#allocation24_spill]] %s1479_s20  ;;  %p1487_p3 = pnand %p862_p0, %p291_p2 }
  0x1b   : > { %s1788_s3 = sld [smem:[#allocation34_spill]]  ;;  %s304_s26 = sshll.u32 %s1355_s25, 4  ;;  %s305_s26 = int_to_ptr.vmem [resolvable:$true] %s304_s26 }
  0x1c   : > { %s1789_s24 = scalar_select %p1487_p3, 1, 0 }
  0x1d   : > { %p907_p4 = pneg %p1487_p3  ;;  %s1758_s28 = smov 128  }
  0x1e   : > { %1790 = sst [smem:[#allocation25_spill]] %s1789_s24  ;;  %s1759_s29 = smov 8  }
  0x1f   : > { %p1495_p5 = pnand %p907_p4, %p71_p1  ;;  %s41_s21 = sadd.s32 1, %s1341_s16 }
  0x20   : > { %p1505_p6 = scmp.ge.s32.totalorder %s41_s21, 3  ;;  %p65_p7 = scmp.eq.s32.totalorder %s1353_s19, 0 }
  0x21   : > { %s302_s23 = sshll.u32 %s1788_s3, 4  ;;  %p92_p8 = scmp.ne.s32.totalorder %s1313_s11, %s1309_s10  ;;  %s303_s23 = int_to_ptr.hbm [resolvable:$true] %s302_s23 }
  0x22   : > { %910 = dma.hbm_to_vmem [thread:$0]  (!%p1495_p5), %s303_s23, 2048, %s305_s26, [#allocation12], %s1758_s28, %s1758_s28, %s1759_s29  }
  0x23   : > { %s1844_s21 = smov (%p1505_p6, %s41_s21), 0  ;;  %p98_p9 = scmp.ne.s32.totalorder %s1309_s10, %s1305_s30 }
  0x24   : > { %p930_p10 = scmp.lt.s32.totalorder %s1353_s19, 12  ;;  %p94_p11 = por %p92_p8, %p65_p7 }
  0x25   : > { %p1527_p12 = por %p98_p9, %p71_p1  ;;  %s365_s26 = sand.u32 1, %s1353_s19  }
  0x26   : > { %s367_s25 = sand.u32 1, %s1313_s11   ;;  %s889_s3 = smul.u32 3, %s1349_s18 }
  0x27   : > { %s1793_s23 = scalar_select %p1527_p12, 1, 0 }
  0x28   : > { %s1533_s28 = sshll.u32 %s367_s25, 3  ;;  %p1539_p13 = pnand %p930_p10, %p94_p11 }
  0x29   : > { %1794 = sst [smem:[#allocation26_spill]] %s1793_s23  ;;  %s369_s29 = scalar_lea.vmem [#allocation8], %s1533_s28 }
  0x2a   : > { %s379_s14 = sshll.u32 %s369_s29, 4  ;;  %s373_s9 = sadd.s32 %s1341_s16, %s889_s3  ;;  %s380_s14 = int_to_ptr.vmem [resolvable:$true] %s379_s14 }
  0x2b   : > { %s870_s15 = sshll.u32 %s373_s9, 3  ;;  %s1796_s1 = sld [smem:[#allocation32_spill]] }
  0x2c   : > { %s1797_s2 = sld [smem:[#allocation33_spill]]  ;;  %s1555_s6 = scalar_lea.sflag [#allocation9], %s365_s26 }
  0x2d   : > { %s1798_s5 = sld [smem:[#allocation36_spill]]  ;;  %s1800_s23 = smov 128  }
  0x2e   : > { %s861_s24 = sadd.s32 4294967294, %s1353_s19   ;;  %s44_s26 = sadd.s32 1, %s1345_s17 }
  0x2f   : > { %s1846_s26 = smov (!%p1505_p6, %s44_s26), %s1345_s17  ;;  %s57_s25 = sadd.s32 1, %s1325_s8 }
  0x30   : > { %p64_p0 = scmp.ne.s32.totalorder %s1325_s8, %s1321_s12  ;;  %p46_p2 = scmp.ge.s32.totalorder %s1846_s26, 2 }
  0x31   : > { %s375_s4 = scalar_lea.hbm %s1796_s1, %s870_s15  ;;  %p70_p4 = scmp.ne.s32.totalorder %s1321_s12, %s1317_s7 }
  0x32   : > { %s377_s29 = sshll.u32 %s375_s4, 4  ;;  %s1550_s10 = scalar_lea.hbm %s1797_s2, %s870_s15  ;;  %s378_s29 = int_to_ptr.hbm [resolvable:$true] %s377_s29 }
  0x33   : > { %s319_s9 = sshll.u32 %s1798_s5, 4  ;;  %s1358_s4 = smov [#allocation13]   ;;  %s320_s9 = int_to_ptr.hbm [resolvable:$true] %s319_s9 }
  0x34   : > { %920 = dma.hbm_to_vmem [thread:$0]  (!%p1539_p13), %s378_s29, 128, %s380_s14, %s1555_s6  }
  0x35   : > { %s321_s13 = sshll.u32 %s1358_s4, 4  ;;  %s1799_s15 = smov 8   ;;  %s322_s13 = int_to_ptr.vmem [resolvable:$true] %s321_s13 }
  0x36   : > { %913 = dma.hbm_to_vmem [thread:$0]  (!%p1495_p5), %s320_s9, 2048, %s322_s13, [#allocation12], %s1800_s23, %s1800_s23, %s1799_s15  }
  0x37   : > { %p1577_p8 = por %p65_p7, %p64_p0  ;;  %p278_p9 = scmp.eq.s32.totalorder %s1479_s20, 11 }
  0x38   : > { %s1848_s26 = smov (%p46_p2, %s1846_s26), 0  ;;  %s1803_s27 = sadd.s32 1, %s1349_s18 }
  0x39   : > { %1802 = sst [smem:[#allocation27_spill]] %s1848_s26  ;;  %s1850_s27 = smov (!%p46_p2, %s1803_s27), %s1349_s18 }
  0x3a   : > { %s53_s22 = ssub.s32 %s1345_s17, %s1848_s26  ;;  %p1591_p5 = por %p71_p1, %p70_p4 }
  0x3b   : > { %p50_p6 = scmp.ge.s32.totalorder %s1850_s27, 2  ;;  %p1595_p7 = por %p278_p9, %p64_p0 }
  0x3c   : > { %s1804_s29 = scalar_select %p1591_p5, 1, 0 }
  0x3d   : > { %s1806_s3 = scalar_select %p1595_p7, 1, 0 }
  0x3e   : > { %1805 = sst [smem:[#allocation28_spill]] %s1804_s29  ;;  %p284_p11 = scmp.eq.s32.totalorder %s861_s24, 11 }
  0x3f   : > { %1807 = sst [smem:[#allocation29_spill]] %s1806_s3  ;;  %s344_s9 = sand.u32 1, %s1325_s8  }
  0x40   : > { %s1852_s27 = smov (%p50_p6, %s1850_s27), 0  ;;  %p1602_p2 = por %p284_p11, %p70_p4 }
  0x41   : > { %1808 = sst [smem:[#allocation30_spill]] %s1852_s27  ;;  %s52_s13 = ssub.s32 %s1349_s18, %s1852_s27 }
  0x42   : > { %s1809_s4 = scalar_select %p1602_p2, 1, 0 }
  0x43   : > { %s866_s15 = sshll.u32 %s344_s9, 3  ;;  %s54_s23 = sor.u32 %s53_s22, %s52_s13 }
  0x44   : > { %1810 = sst [smem:[#allocation31_spill]] %s1809_s4  ;;  %s1811_s1 = ssub.s32 %s1341_s16, %s1844_s21 }
  0x45   : > { %s82_s2 = sor.u32 %s1811_s1, %s52_s13  ;;  %p55_p0 = scmp.eq.s32.totalorder %s54_s23, 0 }
  0x46   : > { %p83_p9 = scmp.eq.s32.totalorder %s82_s2, 0  ;;  %s867_s5 = sshll.u32 %s1349_s18, 1 }
  0x47   : > { %s1613_s24 = scalar_select %p55_p0, %s1325_s8, %s57_s25  }
  0x48   : > { %s1812_s26 = sadd.s32 1, %s1313_s11  ;;  %s352_s3 = sadd.s32 %s1345_s17, %s867_s5 }
  0x49   : > { %s1618_s7 = scalar_select %p83_p9, %s1313_s11, %s1812_s26  }
  0x4a   : > { %s348_s4 = scalar_lea.vmem [#allocation5], %s866_s15  ;;  %s868_s27 = sshll.u32 %s352_s3, 3 }
  0x4b   : > { %s358_s20 = sshll.u32 %s348_s4, 4  ;;  %s354_s1 = scalar_lea.hbm %s1747_s0, %s868_s27  ;;  %s359_s20 = int_to_ptr.vmem [resolvable:$true] %s358_s20 }
  0x4c   : > { %p915_p4 = pnand %p930_p10, %p1577_p8  ;;  %s356_s2 = sshll.u32 %s354_s1, 4  ;;  %s357_s2 = int_to_ptr.hbm [resolvable:$true] %s356_s2 }
  0x4d   : > { %s398_s25 = sshll.u32 %s1550_s10, 4  ;;  %s345_s13 = scalar_lea.sflag [#allocation6], %s344_s9  ;;  %s399_s25 = int_to_ptr.hbm [resolvable:$true] %s398_s25 }
  0x4e   : > { %917 = dma.hbm_to_vmem [thread:$0]  (!%p915_p4), %s357_s2, 128, %s359_s20, %s345_s13  }
  0x4f   : > { %s390_s5 = scalar_lea.vmem [#allocation10], %s1533_s28  ;;  %409 = sbr.rel (%p1487_p3) target bundleno = 1033 (0x409), region = 56 }
  0x50   : > { %s400_s26 = sshll.u32 %s390_s5, 4  ;;  %s1636_s27 = sand.u32 (!%p1487_p3), 1, %s1321_s12   ;;  %s401_s26 = int_to_ptr.vmem [resolvable:$true] %s400_s26 }
  0x51   : > { %923 = dma.hbm_to_vmem [thread:$0]  (!%p1539_p13), %s399_s25, 128, %s401_s26, %s1555_s6  }
  0x52   : > { %s874_s14 = sshll.u32 (!%p1487_p3), %s1636_s27, 3  ;;  %s412_s10 = scalar_lea.sflag (!%p1487_p3), [#allocation6], %s1636_s27 }
  0x53   : > { %s415_s4 = scalar_lea.vmem (!%p1487_p3), [#allocation5], %s874_s14 }
  0x54   : > { %1288 = dma.done.wait (%p1591_p5), %s412_s10, 128  }
  0x55   : > { %1290 = vsyncadd (%p1591_p5), %s412_s10, 4294967168  ;;  %s1815_s20 = sld [smem:[#allocation24_spill]] }
  0x56   : > { %s1816_s28 = sld [smem:[#allocation19_spill]] }
  0x5b   : > { %s421_s6 = sand.u32 1, %s1815_s20  }
  0x5c   : > { %s423_s9 = sand.u32 1, %s1816_s28   ;;  %s422_s23 = scalar_lea.sflag [#allocation9], %s421_s6 }
  0x5d   : > { %s1646_s15 = sshll.u32 %s423_s9, 3 }
  0x5e   : > { %s425_s22 = scalar_lea.vmem [#allocation8], %s1646_s15 }
  0x5f   : > { %1292 = dma.done.wait (%p1527_p12), %s422_s23, 256  }
  0x60   : > { %1294 = vsyncadd (%p1527_p12), %s422_s23, 4294967040  ;;  %s435_s1 = scalar_lea.vmem [#allocation10], %s1646_s15 }
  0x61   : > { %1296 = dma.done.wait (%p71_p1), [#allocation12], 4096  }
  0x62   : > { %1298 = vsyncadd (%p71_p1), [#allocation12], 4294963200  ;;  %s1658_s2 = scalar_lea.vmem [#allocation14], %s874_s14  ;;  %s1818_s25 = sld [smem:[#allocation21_spill]] }
  0x68   : > { %p880_p3 = scmp.ne.s32.totalorder %s1818_s25, 0 }
  0x6a   : > { %494 = sbr.rel (%p880_p3) target bundleno = 115 (0x73), region = 80 }
  0x6f   : > { %vm495_vm0 = vcmask 7168   ;;  %v1359_v0 = vmov -inf   ;;  %v1360_v1 = vmov 0.0  }
  0x70   : > { %496 = vst.msk [vmem:[#allocation2] sm:$0xff] %vm495_vm0, %v1359_v0 }
  0x71   : > { %497 = vst.msk [vmem:[#allocation3] sm:$0xff] %vm495_vm0, %v1360_v1 }
  0x72   : > { %498 = vst [vmem:[#allocation4] sm:$0xff] %v1360_v1 }
  0x73 PF: > { %v500_v2 = vld [vmem:[%s425_s22] sm:$0xff]  ;;  %s1819_s13 = sld [smem:[#allocation21_spill]]  ;;  %v1661_v3 = vld [vmem:[%s415_s4] sm:$0xff]  ;;  %v523_v4 = vlaneseq  ;;  %vm531_vm2 = vcmask 64512   ;;  %v1361_v12 = vmov 0   ;;  %vm553_vm3 = vcmask 7168  }
  0x74   : > { %517 = vmatpush.xpose.msra.mxu0 %v500_v2  ;;  %1046 = vset.pattern.permute.xlu0 %v1361_v12  ;;  %v501_v19 = vld [vmem:[%s435_s1] sm:$0xff] }
  0x75   : > { %v524_v5 = vand.u32 127, %v523_v4  ;;  %1047 = vset.pattern.permute.xlu1 %v1361_v12  ;;  %580 = vmatpush.msra.mxu1 %v501_v19 }
  0x77   : > { %518 = vmatmul.f32.vlgmr.msra.gmra.mxu0 %v1661_v3  ;;  %v530_v13 = vld [vmem:[#allocation2] sm:$0xff] }
  0x78   : > { %v547_v26 = vld [vmem:[#allocation3] sm:$0xff] }
  0x79   : > { %s881_s5 = sshll.u32 %s1819_s13, 3  ;;  %v555_v30 = vld [vmem:[#allocation4] sm:$0xff]  ;;  %p883_p1 = scmp.ne.s32.totalorder %s1819_s13, 2 }
  0x7a   : > { %v526_v6 = vstv %s881_s5  ;;  %s1820_s29 = sld [smem:[#allocation35_spill]] (!%p883_p1) }
  0x7b   : > { %v527_v7 = vadd.s32 %v526_v6, %v524_v5  ;;  %s1821_s4 = sld [smem:[#allocation37_spill]] (!%p883_p1) }
  0x7d   : > { %vm528_vm1 = vcmp.lt.s32.totalorder %v527_v7, 20 }
  0xf4   : > { %v519_v8 = vpop.f32.mrf.mxu0 }
  0xf5   : > { %v522_v9 = vmul.f32 0.17677669, %v519_v8 }
  0xf7   : > { %v529_v10 = vsel %vm528_vm1, %v522_v9, -1e+30 }
  0xf8   : > { %v532_v11 = vsel %vm531_vm2, %v529_v10, -inf }
  0xf9   : > { %533 = vmax.xlane.f32.xlu0 %v532_v11 }
 0x16c   : > { %v534_v14 = vpop.xlane.xlu0 %533 }
 0x16d   : > { %v535_v15 = vmax.f32 %v530_v13, %v534_v14 }
 0x16f   : > { %v536_v16 = vsub.f32 %v530_v13, %v535_v15  ;;  %587 = vst.msk [vmem:[#allocation2] sm:$0xff] %vm553_vm3, %v535_v15  ;;  %541 = vperm.xlu0 %1046, %v535_v15  }
 0x171   : > { %v537_v17 = vmul.f32 1.442695, %v536_v16 }
 0x173   : > { %1048 = vpow2.f32 %v537_v17 }
 0x179   : > { %v1049_v18 = vpop.eup %1048 }
 0x17a   : > { %558 = vperm.xlu1 %1047, %v1049_v18   ;;  %v548_v27 = vmul.f32 %v1049_v18, %v547_v26 }
 0x1e1   : > { %v542_v20 = vpop.permute.xlu0 %541 }
 0x1e2   : > { %v544_v21 = vsub.f32 %v529_v10, %v542_v20 }
 0x1e4   : > { %v545_v22 = vmul.f32 1.442695, %v544_v21 }
 0x1e6   : > { %1050 = vpow2.f32 %v545_v22 }
 0x1ec   : > { %v1051_v23 = vpop.eup %1050  ;;  %v559_v25 = vpop.permute.xlu1 %558 }
 0x1ed   : > { %882 = vmatmul.msk.f32.vlgmr.msra.gmra.mxu1 %vm531_vm2, %v1051_v23  ;;  %v549_v24 = vsel %vm531_vm2, %v1051_v23, 0.0  ;;  %v561_v31 = vmul.f32 %v559_v25, %v555_v30 }
 0x1ee   : > { %550 = vadd.xlane.f32.xlu1 %v549_v24 }
 0x261   : > { %v551_v28 = vpop.xlane.xlu1 %550 }
 0x262   : > { %v552_v29 = vadd.f32 %v551_v28, %v548_v27 }
 0x264   : > { %554 = vst.msk [vmem:[#allocation3] sm:$0xff] %vm553_vm3, %v552_v29 }
 0x269   : > { %591 = sbr.rel (%p883_p1) target bundleno = 1010 (0x3f2), region = 84 }
 0x26a   : > { %v582_v32 = vpop.f32.mrf.mxu1 }
 0x26b   : > { %v585_v33 = vadd.f32 %v582_v32, %v561_v31 }
 0x26d   : > { %586 = vst [vmem:[#allocation4] sm:$0xff] %v585_v33 }
 0x26e   : > { %v592_v34 = vld [vmem:[#allocation3] sm:$0xff]  ;;  %v617_v35 = vld [vmem:[#allocation11 + $0x78] sm:$0xff]  ;;  %v616_v36 = vld [vmem:[#allocation11 + $0x70] sm:$0xff]  ;;  %v1362_v37 = vmov 0  }
 0x26f   : > { %1052 = vset.pattern.permute.xlu0 %v1362_v37  ;;  %1055 = vrcp.f32 %v592_v34  ;;  %622 = vmatpush.msra.mxu0 %v617_v35  ;;  %v615_v38 = vld [vmem:[#allocation11 + $0x68] sm:$0xff]  ;;  %v614_v39 = vld [vmem:[#allocation11 + $0x60] sm:$0xff]  ;;  %v613_v40 = vld [vmem:[#allocation11 + $0x58] sm:$0xff] }
 0x270   : > { %v612_v42 = vld [vmem:[#allocation11 + $0x50] sm:$0xff]  ;;  %v611_v43 = vld [vmem:[#allocation11 + $0x48] sm:$0xff]  ;;  %v610_v44 = vld [vmem:[#allocation11 + $0x40] sm:$0xff] }
 0x271   : > { %623 = vmatpush.msra.mxu0 %v616_v36  ;;  %v609_v45 = vld [vmem:[#allocation11 + $0x38] sm:$0xff]  ;;  %v608_v46 = vld [vmem:[#allocation11 + $0x30] sm:$0xff]  ;;  %v607_v47 = vld [vmem:[#allocation11 + $0x28] sm:$0xff] }
 0x272   : > { %v606_v48 = vld [vmem:[#allocation11 + $0x20] sm:$0xff]  ;;  %v605_v49 = vld [vmem:[#allocation11 + $0x18] sm:$0xff]  ;;  %v604_v50 = vld [vmem:[#allocation11 + $0x10] sm:$0xff] }
 0x273   : > { %624 = vmatpush.msra.mxu0 %v615_v38  ;;  %v603_v51 = vld [vmem:[#allocation11 + $0x8] sm:$0xff]  ;;  %v602_v52 = vld [vmem:[#allocation11] sm:$0xff]  ;;  %v658_v53 = vld [vmem:[#allocation13 + $0x78] sm:$0xff] }
 0x274   : > { %v657_v54 = vld [vmem:[#allocation13 + $0x70] sm:$0xff]  ;;  %663 = vmatpush.msra.mxu1 %v658_v53  ;;  %v656_v55 = vld [vmem:[#allocation13 + $0x68] sm:$0xff]  ;;  %v655_v56 = vld [vmem:[#allocation13 + $0x60] sm:$0xff] }
 0x275   : > { %v1056_v41 = vpop.eup %1055  ;;  %625 = vmatpush.msra.mxu0 %v614_v39  ;;  %v654_v57 = vld [vmem:[#allocation13 + $0x58] sm:$0xff]  ;;  %v653_v58 = vld [vmem:[#allocation13 + $0x50] sm:$0xff]  ;;  %v652_v59 = vld [vmem:[#allocation13 + $0x48] sm:$0xff] }
 0x276   : > { %597 = vperm.xlu0 %1052, %v1056_v41   ;;  %664 = vmatpush.msra.mxu1 %v657_v54  ;;  %v651_v60 = vld [vmem:[#allocation13 + $0x40] sm:$0xff]  ;;  %v650_v61 = vld [vmem:[#allocation13 + $0x38] sm:$0xff]  ;;  %v649_v62 = vld [vmem:[#allocation13 + $0x30] sm:$0xff] }
 0x277   : > { %626 = vmatpush.msra.mxu0 %v613_v40  ;;  %v648_v63 = vld [vmem:[#allocation13 + $0x28] sm:$0xff]  ;;  %v647_v0 = vld [vmem:[#allocation13 + $0x20] sm:$0xff]  ;;  %v646_v1 = vld [vmem:[#allocation13 + $0x18] sm:$0xff] }
 0x278   : > { %665 = vmatpush.msra.mxu1 %v656_v55  ;;  %v594_v2 = vld [vmem:[#allocation4] sm:$0xff]  ;;  %v645_v7 = vld [vmem:[#allocation13 + $0x10] sm:$0xff]  ;;  %v643_v9 = vld [vmem:[#allocation13] sm:$0xff] }
 0x279   : > { %627 = vmatpush.msra.mxu0 %v612_v42  ;;  %v644_v8 = vld [vmem:[#allocation13 + $0x8] sm:$0xff]  ;;  %v1053_v10 = vld [vmem:[%s1820_s29] ss:$0 sm:$0xff] }
 0x27a   : > { %666 = vmatpush.msra.mxu1 %v655_v56 }
 0x27b   : > { %628 = vmatpush.msra.mxu0 %v611_v43 }
 0x27c   : > { %667 = vmatpush.msra.mxu1 %v654_v57 }
 0x27d   : > { %629 = vmatpush.msra.mxu0 %v610_v44 }
 0x27e   : > { %668 = vmatpush.msra.mxu1 %v653_v58 }
 0x27f   : > { %630 = vmatpush.msra.mxu0 %v609_v45 }
 0x280   : > { %669 = vmatpush.msra.mxu1 %v652_v59 }
 0x281   : > { %631 = vmatpush.msra.mxu0 %v608_v46 }
 0x282   : > { %670 = vmatpush.msra.mxu1 %v651_v60 }
 0x283   : > { %632 = vmatpush.msra.mxu0 %v607_v47 }
 0x284   : > { %671 = vmatpush.msra.mxu1 %v650_v61 }
 0x285   : > { %633 = vmatpush.msra.mxu0 %v606_v48 }
 0x286   : > { %672 = vmatpush.msra.mxu1 %v649_v62 }
 0x287   : > { %634 = vmatpush.msra.mxu0 %v605_v49 }
 0x288   : > { %673 = vmatpush.msra.mxu1 %v648_v63 }
 0x289   : > { %635 = vmatpush.msra.mxu0 %v604_v50 }
 0x28a   : > { %674 = vmatpush.msra.mxu1 %v647_v0 }
 0x28b   : > { %636 = vmatpush.msra.mxu0 %v603_v51 }
 0x28c   : > { %675 = vmatpush.msra.mxu1 %v646_v1 }
 0x28d   : > { %637 = vmatpush.msra.mxu0 %v602_v52 }
 0x28e   : > { %676 = vmatpush.msra.mxu1 %v645_v7 }
 0x290   : > { %677 = vmatpush.msra.mxu1 %v644_v8 }
 0x292   : > { %678 = vmatpush.msra.mxu1 %v643_v9 }
 0x2e8   : > { %v598_v4 = vpop.permute.xlu0 %597 }
 0x2e9   : > { %v600_v5 = vmul.f32 %v598_v4, %v594_v2 }
 0x2eb   : > { %v601_v6 = vadd.f32 %v600_v5, %v1661_v3  ;;  %v1054_v3 = vld [vmem:[%s1821_s4] ss:$0 sm:$0xff] }
 0x2ed   : > { %638 = vmatmul.f32.vlgmr.msra.gmra.mxu0 %v601_v6 }
 0x36a   : > { %v639_v11 = vpop.f32.mrf.mxu0 }
 0x36b   : > { %v640_v12 = vadd.f32 %v1053_v10, %v639_v11 }
 0x36d   : > { %v642_v13 = vmax.f32 %v640_v12, 0.0 }
 0x36f   : > { %679 = vmatmul.f32.vlgmr.msra.gmra.mxu1 %v642_v13 }
 0x3ec   : > { %v680_v14 = vpop.f32.mrf.mxu1 }
 0x3ed   : > { %v681_v15 = vadd.f32 %v1054_v3, %v680_v14 }
 0x3ef   : > { %v683_v16 = vadd.f32 %v681_v15, %v601_v6 }
 0x3f1   : > { %684 = vst [vmem:[%s1658_s2] sm:$0xff] %v683_v16 }
 0x3f2 PF: > { %s1822_s20 = sld [smem:[#allocation23_spill]]  ;;  %s700_s15 = sshll.u32 %s1658_s2, 4  ;;  %s701_s15 = int_to_ptr.vmem [resolvable:$true] %s700_s15 }
 0x3f3   : > { %s1823_s28 = sld [smem:[#allocation22_spill]]  ;;  %s686_s26 = scalar_lea.sflag [#allocation7], %s1636_s27 }
 0x3f4   : > { %s1825_s25 = sld [smem:[#allocation38_spill]] }
 0x3f8   : > { %s885_s6 = sshll.u32 %s1822_s20, 1 }
 0x3f9   : > { %s696_s9 = sadd.s32 %s1823_s28, %s885_s6 }
 0x3fa   : > { %s886_s23 = sshll.u32 %s696_s9, 3  ;;  %s1227_s2 = scalar_lea.hbm %s1825_s25, 32 }
 0x3fb   : > { %s698_s13 = scalar_lea.hbm %s1825_s25, %s886_s23 }
 0x3fc   : > { %s702_s5 = sshll.u32 %s698_s13, 4  ;;  %s703_s5 = int_to_ptr.hbm [resolvable:$true] %s702_s5 }
 0x3fd   : > { %s1221_s3 = sshra.s32 %s703_s5, 4  ;;  %s1222_s3 = int_to_ptr.hbm [resolvable:$true] %s1221_s3 }
 0x3fe   : > { %s1223_s29 = scalar_lea.hbm %s1222_s3, 8  ;;  %p1228_p8 = scmp.lt.s32.totalorder %s1222_s3, %s1825_s25 }
 0x3ff   : > { %p1224_p10 = scmp.ne.s32.totalorder %s1222_s3, %s1223_s29  ;;  %p1229_p5 = scmp.lt.s32.totalorder %s1227_s2, %s1223_s29 }
 0x401   : > { %p1225_p12 = pnand %p1224_p10, %p1595_p7  ;;  %p1230_p6 = por %p1229_p5, %p1228_p8 }
 0x403   : > { %p1226_p13 = pneg %p1225_p12 }
 0x405   : > { %p1231_p11 = pnand %p1230_p6, %p1226_p13 }
 0x407   : > { %1234 = shalt.err (!%p1231_p11)
}
 0x408   : > { %905 = dma.vmem_to_hbm [thread:$0]  (%p1595_p7), %s701_s15, 128, %s703_s5, %s686_s26  }
 0x409 PF: > { %s1826_s27 = sld [smem:[#allocation20_spill]]  ;;  %p933_p0 = scmp.ge.s32.totalorder %s1353_s19, 2 }
 0x40b   : > { %p925_p9 = pnand %p933_p0, %p1602_p2 }
 0x40d   : > { %p926_p4 = pneg %p925_p9 }
 0x40f   : > { %s714_s6 = sand.u32 1, %s1826_s27  }
 0x410   : > { %s715_s9 = scalar_lea.sflag [#allocation7], %s714_s6 }
 0x411   : > { %1300 = dma.done.wait (%p926_p4), %s715_s9, 128  }
 0x412   : > { %1302 = vsyncadd (%p926_p4), %s715_s9, 4294967168  ;;  %s29_s19 = sadd.s32 1, %s1353_s19   ;;  %s1829_s30 = sld [smem:[#allocation19_spill]] }
 0x413   : > { %p1703_p3 = scmp.ge.s32.totalorder %s29_s19, 14   ;;  %s1830_s22 = sld [smem:[#allocation27_spill]] }
 0x414   : > { %s1831_s1 = sld [smem:[#allocation30_spill]]  ;;  %s1832_s10 = smov %s1313_s11 }
 0x415   : > { %s1833_s11 = smov %s1618_s7  ;;  %s1834_s7 = smov %s1321_s12 }
 0x416   : > { %s1835_s12 = smov %s1325_s8  ;;  %s1836_s8 = smov %s1613_s24 }
 0x417   : > { %s1837_s13 = smov %s1341_s16  ;;  %s1838_s14 = smov %s1345_s17 }
 0x418   : > { %s1839_s15 = smov %s1349_s18  ;;  %s1840_s16 = smov %s1844_s21 }
 0x419   : > { %s1841_s17 = smov %s1830_s22  ;;  %28 = sbr.rel (!%p1703_p3) target bundleno = 21 (0x15), region = 141 }
 0x41a   : > { %s1842_s18 = smov %s1831_s1 }
 0x41e   :  { %721 = vsyncpa [#allocation6], 1 }
 0x41f   :  { %723 = vsyncpa [#allocation6 + $0x1], 1 }
 0x420   :  { %724 = vsyncpa [#allocation9], 1 }
 0x421   :  { %726 = vsyncpa [#allocation9 + $0x1], 1 }
 0x422   :  { %727 = vsyncpa [#allocation12], 1 }
 0x423   :  { %728 = vsyncpa [#allocation7], 1 }
 0x424   :  { %730 = vsyncpa [#allocation7 + $0x1], 1 }

// kernel: tpu_custom_call.1
= control target key start
LH: loop header
LB: loop body
LE: loop exit
PB: predicated region body
PF: predicated region fallthrough
CT: control target
= control target key end

     0   :  { %s1747_s0 = inlined_call_operand.hbm [shape: f32[2,16,128], index: 0, kind: input, shape index: {}]   ;;  %s1748_s1 = inlined_call_operand.hbm [shape: f32[2,24,128], index: 1, kind: input, shape index: {}]   ;;  %s1749_s2 = inlined_call_operand.hbm [shape: f32[2,24,128], index: 2, kind: input, shape index: {}]   ;;  %s1750_s3 = inlined_call_operand.hbm [shape: f32[128,128], index: 3, kind: input, shape index: {}]   ;;  %s1751_s4 = inlined_call_operand.vmem [shape: f32[1,128], index: 4, kind: input, shape index: {}]   ;;  %s1752_s5 = inlined_call_operand.hbm [shape: f32[128,128], index: 5, kind: input, shape index: {}]   ;;  %s1753_s6 = inlined_call_operand.vmem [shape: f32[1,128], index: 6, kind: input, shape index: {}]   ;;  %s1754_s7 = inlined_call_operand.vmem [shape: f32[1,128], index: 7, kind: input, shape index: {}]   ;;  %s1755_s8 = inlined_call_operand.vmem [shape: f32[1,128], index: 8, kind: input, shape index: {}]   ;;  %s1756_s9 = inlined_call_operand.hbm [shape: f32[2,16,128], index: 9, kind: output, shape index: {}]  }
   0x1   :  { %1775 = sst [smem:[#allocation32_spill]] %s1748_s1 }
   0x2   :  { %1776 = sst [smem:[#allocation33_spill]] %s1749_s2 }
   0x3   :  { %1777 = sst [smem:[#allocation34_spill]] %s1750_s3 }
   0x4   :  { %1778 = sst [smem:[#allocation35_spill]] %s1751_s4 }
   0x5   :  { %1779 = sst [smem:[#allocation36_spill]] %s1752_s5 }
   0x6   :  { %1780 = sst [smem:[#allocation37_spill]] %s1753_s6 }
   0x7   :  { %1781 = sst [smem:[#allocation38_spill]] %s1756_s9 }
   0x8   :  { %14 = vsyncpa [#allocation6], 0 }
   0x9   :  { %16 = vsyncpa [#allocation6 + $0x1], 0 }
   0xa   :  { %17 = vsyncpa [#allocation9], 0 }
   0xb   :  { %19 = vsyncpa [#allocation9 + $0x1], 0 }
   0xc   :  { %20 = vsyncpa [#allocation12], 0 }
   0xd   :  { %21 = vsyncpa [#allocation7], 0 }
   0xe   :  { %23 = vsyncpa [#allocation7 + $0x1], 0  ;;  %s1413_s30 = smov 0   ;;  %s1415_s10 = smov 0  }
   0xf   :  { %s1417_s11 = smov 0   ;;  %s1419_s7 = smov 0  }
  0x10   :  { %s1421_s12 = smov 0   ;;  %s1423_s8 = smov 0  }
  0x11   :  { %s1425_s13 = smov 0   ;;  %s1427_s14 = smov 0  }
  0x12   :  { %s1429_s15 = smov 0   ;;  %s1431_s16 = smov 0  }
  0x13   :  { %s1433_s17 = smov 0   ;;  %s1435_s18 = smov 0  }
  0x14   :  { %s1437_s19 = smov 0  }
  0x15 LB: > { %1782 = sst [smem:[#allocation19_spill]] %s1309_s10  ;;  %s1479_s20 = sadd.s32 4294967295, %s1353_s19   ;;  %s1353_s19 = sphi %s1437_s19, %s29_s19   ;;  %s1349_s18 = sphi %s1435_s18, %s1842_s18   ;;  %s1345_s17 = sphi %s1433_s17, %s1841_s17   ;;  %s1341_s16 = sphi %s1431_s16, %s1840_s16   ;;  %s1337_s15 = sphi %s1429_s15, %s1839_s15   ;;  %s1333_s14 = sphi %s1427_s14, %s1838_s14   ;;  %s1329_s13 = sphi %s1425_s13, %s1837_s13   ;;  %s1325_s8 = sphi %s1423_s8, %s1836_s8   ;;  %s1321_s12 = sphi %s1421_s12, %s1835_s12   ;;  %s1317_s7 = sphi %s1419_s7, %s1834_s7   ;;  %s1313_s11 = sphi %s1417_s11, %s1833_s11   ;;  %s1309_s10 = sphi %s1415_s10, %s1832_s10   ;;  %s1305_s30 = sphi %s1413_s30, %s1829_s30  }
  0x16   : > { %1783 = sst [smem:[#allocation20_spill]] %s1317_s7  ;;  %p862_p0 = scmp.ge.s32.totalorder %s1353_s19, 1 }
  0x17   : > { %1784 = sst [smem:[#allocation21_spill]] %s1329_s13  ;;  %p71_p1 = scmp.eq.s32.totalorder %s1479_s20, 0 }
  0x18   : > { %1785 = sst [smem:[#allocation22_spill]] %s1333_s14  ;;  %p291_p2 = scmp.lt.s32.totalorder %s1353_s19, 13 }
  0x19   : > { %1786 = sst [smem:[#allocation23_spill]] %s1337_s15  ;;  %s1355_s25 = smov [#allocation11]  }
  0x1a   : > { %1787 = sst [smem:[#allocation24_spill]] %s1479_s20  ;;  %p1487_p3 = pnand %p862_p0, %p291_p2 }
  0x1b   : > { %s1788_s3 = sld [smem:[#allocation34_spill]]  ;;  %s304_s26 = sshll.u32 %s1355_s25, 4  ;;  %s305_s26 = int_to_ptr.vmem [resolvable:$true] %s304_s26 }
  0x1c   : > { %s1789_s24 = scalar_select %p1487_p3, 1, 0 }
  0x1d   : > { %p907_p4 = pneg %p1487_p3  ;;  %s1758_s28 = smov 128  }
  0x1e   : > { %1790 = sst [smem:[#allocation25_spill]] %s1789_s24  ;;  %s1759_s29 = smov 8  }
  0x1f   : > { %p1495_p5 = pnand %p907_p4, %p71_p1  ;;  %s41_s21 = sadd.s32 1, %s1341_s16 }
  0x20   : > { %p1505_p6 = scmp.ge.s32.totalorder %s41_s21, 3  ;;  %p65_p7 = scmp.eq.s32.totalorder %s1353_s19, 0 }
  0x21   : > { %s302_s23 = sshll.u32 %s1788_s3, 4  ;;  %p92_p8 = scmp.ne.s32.totalorder %s1313_s11, %s1309_s10  ;;  %s303_s23 = int_to_ptr.hbm [resolvable:$true] %s302_s23 }
  0x22   : > { %910 = dma.hbm_to_vmem [thread:$0]  (!%p1495_p5), %s303_s23, 2048, %s305_s26, [#allocation12], %s1758_s28, %s1758_s28, %s1759_s29  }
  0x23   : > { %s1844_s21 = smov (%p1505_p6, %s41_s21), 0  ;;  %p98_p9 = scmp.ne.s32.totalorder %s1309_s10, %s1305_s30 }
  0x24   : > { %p930_p10 = scmp.lt.s32.totalorder %s1353_s19, 12  ;;  %p94_p11 = por %p92_p8, %p65_p7 }
  0x25   : > { %p1527_p12 = por %p98_p9, %p71_p1  ;;  %s365_s26 = sand.u32 1, %s1353_s19  }
  0x26   : > { %s367_s25 = sand.u32 1, %s1313_s11   ;;  %s889_s3 = smul.u32 3, %s1349_s18 }
  0x27   : > { %s1793_s23 = scalar_select %p1527_p12, 1, 0 }
  0x28   : > { %s1533_s28 = sshll.u32 %s367_s25, 3  ;;  %p1539_p13 = pnand %p930_p10, %p94_p11 }
  0x29   : > { %1794 = sst [smem:[#allocation26_spill]] %s1793_s23  ;;  %s369_s29 = scalar_lea.vmem [#allocation8], %s1533_s28 }
  0x2a   : > { %s379_s14 = sshll.u32 %s369_s29, 4  ;;  %s373_s9 = sadd.s32 %s1341_s16, %s889_s3  ;;  %s380_s14 = int_to_ptr.vmem [resolvable:$true] %s379_s14 }
  0x2b   : > { %s870_s15 = sshll.u32 %s373_s9, 3  ;;  %s1796_s1 = sld [smem:[#allocation32_spill]] }
  0x2c   : > { %s1797_s2 = sld [smem:[#allocation33_spill]]  ;;  %s1555_s6 = scalar_lea.sflag [#allocation9], %s365_s26 }
  0x2d   : > { %s1798_s5 = sld [smem:[#allocation36_spill]]  ;;  %s1800_s23 = smov 128  }
  0x2e   : > { %s861_s24 = sadd.s32 4294967294, %s1353_s19   ;;  %s44_s26 = sadd.s32 1, %s1345_s17 }
  0x2f   : > { %s1846_s26 = smov (!%p1505_p6, %s44_s26), %s1345_s17  ;;  %s57_s25 = sadd.s32 1, %s1325_s8 }
  0x30   : > { %p64_p0 = scmp.ne.s32.totalorder %s1325_s8, %s1321_s12  ;;  %p46_p2 = scmp.ge.s32.totalorder %s1846_s26, 2 }
  0x31   : > { %s375_s4 = scalar_lea.hbm %s1796_s1, %s870_s15  ;;  %p70_p4 = scmp.ne.s32.totalorder %s1321_s12, %s1317_s7 }
  0x32   : > { %s377_s29 = sshll.u32 %s375_s4, 4  ;;  %s1550_s10 = scalar_lea.hbm %s1797_s2, %s870_s15  ;;  %s378_s29 = int_to_ptr.hbm [resolvable:$true] %s377_s29 }
  0x33   : > { %s319_s9 = sshll.u32 %s1798_s5, 4  ;;  %s1358_s4 = smov [#allocation13]   ;;  %s320_s9 = int_to_ptr.hbm [resolvable:$true] %s319_s9 }
  0x34   : > { %920 = dma.hbm_to_vmem [thread:$0]  (!%p1539_p13), %s378_s29, 128, %s380_s14, %s1555_s6  }
  0x35   : > { %s321_s13 = sshll.u32 %s1358_s4, 4  ;;  %s1799_s15 = smov 8   ;;  %s322_s13 = int_to_ptr.vmem [resolvable:$true] %s321_s13 }
  0x36   : > { %913 = dma.hbm_to_vmem [thread:$0]  (!%p1495_p5), %s320_s9, 2048, %s322_s13, [#allocation12], %s1800_s23, %s1800_s23, %s1799_s15  }
  0x37   : > { %p1577_p8 = por %p65_p7, %p64_p0  ;;  %p278_p9 = scmp.eq.s32.totalorder %s1479_s20, 11 }
  0x38   : > { %s1848_s26 = smov (%p46_p2, %s1846_s26), 0  ;;  %s1803_s27 = sadd.s32 1, %s1349_s18 }
  0x39   : > { %1802 = sst [smem:[#allocation27_spill]] %s1848_s26  ;;  %s1850_s27 = smov (!%p46_p2, %s1803_s27), %s1349_s18 }
  0x3a   : > { %s53_s22 = ssub.s32 %s1345_s17, %s1848_s26  ;;  %p1591_p5 = por %p71_p1, %p70_p4 }
  0x3b   : > { %p50_p6 = scmp.ge.s32.totalorder %s1850_s27, 2  ;;  %p1595_p7 = por %p278_p9, %p64_p0 }
  0x3c   : > { %s1804_s29 = scalar_select %p1591_p5, 1, 0 }
  0x3d   : > { %s1806_s3 = scalar_select %p1595_p7, 1, 0 }
  0x3e   : > { %1805 = sst [smem:[#allocation28_spill]] %s1804_s29  ;;  %p284_p11 = scmp.eq.s32.totalorder %s861_s24, 11 }
  0x3f   : > { %1807 = sst [smem:[#allocation29_spill]] %s1806_s3  ;;  %s344_s9 = sand.u32 1, %s1325_s8  }
  0x40   : > { %s1852_s27 = smov (%p50_p6, %s1850_s27), 0  ;;  %p1602_p2 = por %p284_p11, %p70_p4 }
  0x41   : > { %1808 = sst [smem:[#allocation30_spill]] %s1852_s27  ;;  %s52_s13 = ssub.s32 %s1349_s18, %s1852_s27 }
  0x42   : > { %s1809_s4 = scalar_select %p1602_p2, 1, 0 }
  0x43   : > { %s866_s15 = sshll.u32 %s344_s9, 3  ;;  %s54_s23 = sor.u32 %s53_s22, %s52_s13 }
  0x44   : > { %1810 = sst [smem:[#allocation31_spill]] %s1809_s4  ;;  %s1811_s1 = ssub.s32 %s1341_s16, %s1844_s21 }
  0x45   : > { %s82_s2 = sor.u32 %s1811_s1, %s52_s13  ;;  %p55_p0 = scmp.eq.s32.totalorder %s54_s23, 0 }
  0x46   : > { %p83_p9 = scmp.eq.s32.totalorder %s82_s2, 0  ;;  %s867_s5 = sshll.u32 %s1349_s18, 1 }
  0x47   : > { %s1613_s24 = scalar_select %p55_p0, %s1325_s8, %s57_s25  }
  0x48   : > { %s1812_s26 = sadd.s32 1, %s1313_s11  ;;  %s352_s3 = sadd.s32 %s1345_s17, %s867_s5 }
  0x49   : > { %s1618_s7 = scalar_select %p83_p9, %s1313_s11, %s1812_s26  }
  0x4a   : > { %s348_s4 = scalar_lea.vmem [#allocation5], %s866_s15  ;;  %s868_s27 = sshll.u32 %s352_s3, 3 }
  0x4b   : > { %s358_s20 = sshll.u32 %s348_s4, 4  ;;  %s354_s1 = scalar_lea.hbm %s1747_s0, %s868_s27  ;;  %s359_s20 = int_to_ptr.vmem [resolvable:$true] %s358_s20 }
  0x4c   : > { %p915_p4 = pnand %p930_p10, %p1577_p8  ;;  %s356_s2 = sshll.u32 %s354_s1, 4  ;;  %s357_s2 = int_to_ptr.hbm [resolvable:$true] %s356_s2 }
  0x4d   : > { %s398_s25 = sshll.u32 %s1550_s10, 4  ;;  %s345_s13 = scalar_lea.sflag [#allocation6], %s344_s9  ;;  %s399_s25 = int_to_ptr.hbm [resolvable:$true] %s398_s25 }
  0x4e   : > { %917 = dma.hbm_to_vmem [thread:$0]  (!%p915_p4), %s357_s2, 128, %s359_s20, %s345_s13  }
  0x4f   : > { %s390_s5 = scalar_lea.vmem [#allocation10], %s1533_s28  ;;  %409 = sbr.rel (%p1487_p3) target bundleno = 1033 (0x409), region = 56 }
  0x50   : > { %s400_s26 = sshll.u32 %s390_s5, 4  ;;  %s1636_s27 = sand.u32 (!%p1487_p3), 1, %s1321_s12   ;;  %s401_s26 = int_to_ptr.vmem [resolvable:$true] %s400_s26 }
  0x51   : > { %923 = dma.hbm_to_vmem [thread:$0]  (!%p1539_p13), %s399_s25, 128, %s401_s26, %s1555_s6  }
  0x52   : > { %s874_s14 = sshll.u32 (!%p1487_p3), %s1636_s27, 3  ;;  %s412_s10 = scalar_lea.sflag (!%p1487_p3), [#allocation6], %s1636_s27 }
  0x53   : > { %s415_s4 = scalar_lea.vmem (!%p1487_p3), [#allocation5], %s874_s14 }
  0x54   : > { %1288 = dma.done.wait (%p1591_p5), %s412_s10, 128  }
  0x55   : > { %1290 = vsyncadd (%p1591_p5), %s412_s10, 4294967168  ;;  %s1815_s20 = sld [smem:[#allocation24_spill]] }
  0x56   : > { %s1816_s28 = sld [smem:[#allocation19_spill]] }
  0x5b   : > { %s421_s6 = sand.u32 1, %s1815_s20  }
  0x5c   : > { %s423_s9 = sand.u32 1, %s1816_s28   ;;  %s422_s23 = scalar_lea.sflag [#allocation9], %s421_s6 }
  0x5d   : > { %s1646_s15 = sshll.u32 %s423_s9, 3 }
  0x5e   : > { %s425_s22 = scalar_lea.vmem [#allocation8], %s1646_s15 }
  0x5f   : > { %1292 = dma.done.wait (%p1527_p12), %s422_s23, 256  }
  0x60   : > { %1294 = vsyncadd (%p1527_p12), %s422_s23, 4294967040  ;;  %s435_s1 = scalar_lea.vmem [#allocation10], %s1646_s15 }
  0x61   : > { %1296 = dma.done.wait (%p71_p1), [#allocation12], 4096  }
  0x62   : > { %1298 = vsyncadd (%p71_p1), [#allocation12], 4294963200  ;;  %s1658_s2 = scalar_lea.vmem [#allocation14], %s874_s14  ;;  %s1818_s25 = sld [smem:[#allocation21_spill]] }
  0x68   : > { %p880_p3 = scmp.ne.s32.totalorder %s1818_s25, 0 }
  0x6a   : > { %494 = sbr.rel (%p880_p3) target bundleno = 115 (0x73), region = 80 }
  0x6f   : > { %vm495_vm0 = vcmask 7168   ;;  %v1359_v0 = vmov -inf   ;;  %v1360_v1 = vmov 0.0  }
  0x70   : > { %496 = vst.msk [vmem:[#allocation2] sm:$0xff] %vm495_vm0, %v1359_v0 }
  0x71   : > { %497 = vst.msk [vmem:[#allocation3] sm:$0xff] %vm495_vm0, %v1360_v1 }
  0x72   : > { %498 = vst [vmem:[#allocation4] sm:$0xff] %v1360_v1 }
  0x73 PF: > { %v500_v2 = vld [vmem:[%s425_s22] sm:$0xff]  ;;  %s1819_s13 = sld [smem:[#allocation21_spill]]  ;;  %v1661_v3 = vld [vmem:[%s415_s4] sm:$0xff]  ;;  %v523_v4 = vlaneseq  ;;  %vm531_vm2 = vcmask 64512   ;;  %v1361_v12 = vmov 0   ;;  %vm553_vm3 = vcmask 7168  }
  0x74   : > { %517 = vmatpush.xpose.msra.mxu0 %v500_v2  ;;  %1046 = vset.pattern.permute.xlu0 %v1361_v12  ;;  %v501_v19 = vld [vmem:[%s435_s1] sm:$0xff] }
  0x75   : > { %v524_v5 = vand.u32 127, %v523_v4  ;;  %1047 = vset.pattern.permute.xlu1 %v1361_v12  ;;  %580 = vmatpush.msra.mxu1 %v501_v19 }
  0x77   : > { %518 = vmatmul.f32.vlgmr.msra.gmra.mxu0 %v1661_v3  ;;  %v530_v13 = vld [vmem:[#allocation2] sm:$0xff] }
  0x78   : > { %v547_v26 = vld [vmem:[#allocation3] sm:$0xff] }
  0x79   : > { %s881_s5 = sshll.u32 %s1819_s13, 3  ;;  %v555_v30 = vld [vmem:[#allocation4] sm:$0xff]  ;;  %p883_p1 = scmp.ne.s32.totalorder %s1819_s13, 2 }
  0x7a   : > { %v526_v6 = vstv %s881_s5  ;;  %s1820_s29 = sld [smem:[#allocation35_spill]] (!%p883_p1) }
  0x7b   : > { %v527_v7 = vadd.s32 %v526_v6, %v524_v5  ;;  %s1821_s4 = sld [smem:[#allocation37_spill]] (!%p883_p1) }
  0x7d   : > { %vm528_vm1 = vcmp.lt.s32.totalorder %v527_v7, 20 }
  0xf4   : > { %v519_v8 = vpop.f32.mrf.mxu0 }
  0xf5   : > { %v522_v9 = vmul.f32 0.17677669, %v519_v8 }
  0xf7   : > { %v529_v10 = vsel %vm528_vm1, %v522_v9, -1e+30 }
  0xf8   : > { %v532_v11 = vsel %vm531_vm2, %v529_v10, -inf }
  0xf9   : > { %533 = vmax.xlane.f32.xlu0 %v532_v11 }
 0x16c   : > { %v534_v14 = vpop.xlane.xlu0 %533 }
 0x16d   : > { %v535_v15 = vmax.f32 %v530_v13, %v534_v14 }
 0x16f   : > { %v536_v16 = vsub.f32 %v530_v13, %v535_v15  ;;  %587 = vst.msk [vmem:[#allocation2] sm:$0xff] %vm553_vm3, %v535_v15  ;;  %541 = vperm.xlu0 %1046, %v535_v15  }
 0x171   : > { %v537_v17 = vmul.f32 1.442695, %v536_v16 }
 0x173   : > { %1048 = vpow2.f32 %v537_v17 }
 0x179   : > { %v1049_v18 = vpop.eup %1048 }
 0x17a   : > { %558 = vperm.xlu1 %1047, %v1049_v18   ;;  %v548_v27 = vmul.f32 %v1049_v18, %v547_v26 }
 0x1e1   : > { %v542_v20 = vpop.permute.xlu0 %541 }
 0x1e2   : > { %v544_v21 = vsub.f32 %v529_v10, %v542_v20 }
 0x1e4   : > { %v545_v22 = vmul.f32 1.442695, %v544_v21 }
 0x1e6   : > { %1050 = vpow2.f32 %v545_v22 }
 0x1ec   : > { %v1051_v23 = vpop.eup %1050  ;;  %v559_v25 = vpop.permute.xlu1 %558 }
 0x1ed   : > { %882 = vmatmul.msk.f32.vlgmr.msra.gmra.mxu1 %vm531_vm2, %v1051_v23  ;;  %v549_v24 = vsel %vm531_vm2, %v1051_v23, 0.0  ;;  %v561_v31 = vmul.f32 %v559_v25, %v555_v30 }
 0x1ee   : > { %550 = vadd.xlane.f32.xlu1 %v549_v24 }
 0x261   : > { %v551_v28 = vpop.xlane.xlu1 %550 }
 0x262   : > { %v552_v29 = vadd.f32 %v551_v28, %v548_v27 }
 0x264   : > { %554 = vst.msk [vmem:[#allocation3] sm:$0xff] %vm553_vm3, %v552_v29 }
 0x269   : > { %591 = sbr.rel (%p883_p1) target bundleno = 1010 (0x3f2), region = 84 }
 0x26a   : > { %v582_v32 = vpop.f32.mrf.mxu1 }
 0x26b   : > { %v585_v33 = vadd.f32 %v582_v32, %v561_v31 }
 0x26d   : > { %586 = vst [vmem:[#allocation4] sm:$0xff] %v585_v33 }
 0x26e   : > { %v592_v34 = vld [vmem:[#allocation3] sm:$0xff]  ;;  %v617_v35 = vld [vmem:[#allocation11 + $0x78] sm:$0xff]  ;;  %v616_v36 = vld [vmem:[#allocation11 + $0x70] sm:$0xff]  ;;  %v1362_v37 = vmov 0  }
 0x26f   : > { %1052 = vset.pattern.permute.xlu0 %v1362_v37  ;;  %1055 = vrcp.f32 %v592_v34  ;;  %622 = vmatpush.msra.mxu0 %v617_v35  ;;  %v615_v38 = vld [vmem:[#allocation11 + $0x68] sm:$0xff]  ;;  %v614_v39 = vld [vmem:[#allocation11 + $0x60] sm:$0xff]  ;;  %v613_v40 = vld [vmem:[#allocation11 + $0x58] sm:$0xff] }
 0x270   : > { %v612_v42 = vld [vmem:[#allocation11 + $0x50] sm:$0xff]  ;;  %v611_v43 = vld [vmem:[#allocation11 + $0x48] sm:$0xff]  ;;  %v610_v44 = vld [vmem:[#allocation11 + $0x40] sm:$0xff] }
 0x271   : > { %623 = vmatpush.msra.mxu0 %v616_v36  ;;  %v609_v45 = vld [vmem:[#allocation11 + $0x38] sm:$0xff]  ;;  %v608_v46 = vld [vmem:[#allocation11 + $0x30] sm:$0xff]  ;;  %v607_v47 = vld [vmem:[#allocation11 + $0x28] sm:$0xff] }
 0x272   : > { %v606_v48 = vld [vmem:[#allocation11 + $0x20] sm:$0xff]  ;;  %v605_v49 = vld [vmem:[#allocation11 + $0x18] sm:$0xff]  ;;  %v604_v50 = vld [vmem:[#allocation11 + $0x10] sm:$0xff] }
 0x273   : > { %624 = vmatpush.msra.mxu0 %v615_v38  ;;  %v603_v51 = vld [vmem:[#allocation11 + $0x8] sm:$0xff]  ;;  %v602_v52 = vld [vmem:[#allocation11] sm:$0xff]  ;;  %v658_v53 = vld [vmem:[#allocation13 + $0x78] sm:$0xff] }
 0x274   : > { %v657_v54 = vld [vmem:[#allocation13 + $0x70] sm:$0xff]  ;;  %663 = vmatpush.msra.mxu1 %v658_v53  ;;  %v656_v55 = vld [vmem:[#allocation13 + $0x68] sm:$0xff]  ;;  %v655_v56 = vld [vmem:[#allocation13 + $0x60] sm:$0xff] }
 0x275   : > { %v1056_v41 = vpop.eup %1055  ;;  %625 = vmatpush.msra.mxu0 %v614_v39  ;;  %v654_v57 = vld [vmem:[#allocation13 + $0x58] sm:$0xff]  ;;  %v653_v58 = vld [vmem:[#allocation13 + $0x50] sm:$0xff]  ;;  %v652_v59 = vld [vmem:[#allocation13 + $0x48] sm:$0xff] }
 0x276   : > { %597 = vperm.xlu0 %1052, %v1056_v41   ;;  %664 = vmatpush.msra.mxu1 %v657_v54  ;;  %v651_v60 = vld [vmem:[#allocation13 + $0x40] sm:$0xff]  ;;  %v650_v61 = vld [vmem:[#allocation13 + $0x38] sm:$0xff]  ;;  %v649_v62 = vld [vmem:[#allocation13 + $0x30] sm:$0xff] }
 0x277   : > { %626 = vmatpush.msra.mxu0 %v613_v40  ;;  %v648_v63 = vld [vmem:[#allocation13 + $0x28] sm:$0xff]  ;;  %v647_v0 = vld [vmem:[#allocation13 + $0x20] sm:$0xff]  ;;  %v646_v1 = vld [vmem:[#allocation13 + $0x18] sm:$0xff] }
 0x278   : > { %665 = vmatpush.msra.mxu1 %v656_v55  ;;  %v594_v2 = vld [vmem:[#allocation4] sm:$0xff]  ;;  %v645_v7 = vld [vmem:[#allocation13 + $0x10] sm:$0xff]  ;;  %v643_v9 = vld [vmem:[#allocation13] sm:$0xff] }
 0x279   : > { %627 = vmatpush.msra.mxu0 %v612_v42  ;;  %v644_v8 = vld [vmem:[#allocation13 + $0x8] sm:$0xff]  ;;  %v1053_v10 = vld [vmem:[%s1820_s29] ss:$0 sm:$0xff] }
 0x27a   : > { %666 = vmatpush.msra.mxu1 %v655_v56 }
 0x27b   : > { %628 = vmatpush.msra.mxu0 %v611_v43 }
 0x27c   : > { %667 = vmatpush.msra.mxu1 %v654_v57 }
 0x27d   : > { %629 = vmatpush.msra.mxu0 %v610_v44 }
 0x27e   : > { %668 = vmatpush.msra.mxu1 %v653_v58 }
 0x27f   : > { %630 = vmatpush.msra.mxu0 %v609_v45 }
 0x280   : > { %669 = vmatpush.msra.mxu1 %v652_v59 }
 0x281   : > { %631 = vmatpush.msra.mxu0 %v608_v46 }
 0x282   : > { %670 = vmatpush.msra.mxu1 %v651_v60 }
 0x283   : > { %632 = vmatpush.msra.mxu0 %v607_v47 }
 0x284   : > { %671 = vmatpush.msra.mxu1 %v650_v61 }
 0x285   : > { %633 = vmatpush.msra.mxu0 %v606_v48 }
 0x286   : > { %672 = vmatpush.msra.mxu1 %v649_v62 }
 0x287   : > { %634 = vmatpush.msra.mxu0 %v605_v49 }
 0x288   : > { %673 = vmatpush.msra.mxu1 %v648_v63 }
 0x289   : > { %635 = vmatpush.msra.mxu0 %v604_v50 }
 0x28a   : > { %674 = vmatpush.msra.mxu1 %v647_v0 }
 0x28b   : > { %636 = vmatpush.msra.mxu0 %v603_v51 }
 0x28c   : > { %675 = vmatpush.msra.mxu1 %v646_v1 }
 0x28d   : > { %637 = vmatpush.msra.mxu0 %v602_v52 }
 0x28e   : > { %676 = vmatpush.msra.mxu1 %v645_v7 }
 0x290   : > { %677 = vmatpush.msra.mxu1 %v644_v8 }
 0x292   : > { %678 = vmatpush.msra.mxu1 %v643_v9 }
 0x2e8   : > { %v598_v4 = vpop.permute.xlu0 %597 }
 0x2e9   : > { %v600_v5 = vmul.f32 %v598_v4, %v594_v2 }
 0x2eb   : > { %v601_v6 = vadd.f32 %v600_v5, %v1661_v3  ;;  %v1054_v3 = vld [vmem:[%s1821_s4] ss:$0 sm:$0xff] }
 0x2ed   : > { %638 = vmatmul.f32.vlgmr.msra.gmra.mxu0 %v601_v6 }
 0x36a   : > { %v639_v11 = vpop.f32.mrf.mxu0 }
 0x36b   : > { %v640_v12 = vadd.f32 %v1053_v10, %v639_v11 }
 0x36d   : > { %v642_v13 = vmax.f32 %v640_v12, 0.0 }
 0x36f   : > { %679 = vmatmul.f32.vlgmr.msra.gmra.mxu1 %v642_v13 }
 0x3ec   : > { %v680_v14 = vpop.f32.mrf.mxu1 }
 0x3ed   : > { %v681_v15 = vadd.f32 %v1054_v3, %v680_v14 }
 0x3ef   : > { %v683_v16 = vadd.f32 %v681_v15, %v601_v6 }
 0x3f1   : > { %684 = vst [vmem:[%s1658_s2] sm:$0xff] %v683_v16 }
 0x3f2 PF: > { %s1822_s20 = sld [smem:[#allocation23_spill]]  ;;  %s700_s15 = sshll.u32 %s1658_s2, 4  ;;  %s701_s15 = int_to_ptr.vmem [resolvable:$true] %s700_s15 }
 0x3f3   : > { %s1823_s28 = sld [smem:[#allocation22_spill]]  ;;  %s686_s26 = scalar_lea.sflag [#allocation7], %s1636_s27 }
 0x3f4   : > { %s1825_s25 = sld [smem:[#allocation38_spill]] }
 0x3f8   : > { %s885_s6 = sshll.u32 %s1822_s20, 1 }
 0x3f9   : > { %s696_s9 = sadd.s32 %s1823_s28, %s885_s6 }
 0x3fa   : > { %s886_s23 = sshll.u32 %s696_s9, 3  ;;  %s1227_s2 = scalar_lea.hbm %s1825_s25, 32 }
 0x3fb   : > { %s698_s13 = scalar_lea.hbm %s1825_s25, %s886_s23 }
 0x3fc   : > { %s702_s5 = sshll.u32 %s698_s13, 4  ;;  %s703_s5 = int_to_ptr.hbm [resolvable:$true] %s702_s5 }
 0x3fd   : > { %s1221_s3 = sshra.s32 %s703_s5, 4  ;;  %s1222_s3 = int_to_ptr.hbm [resolvable:$true] %s1221_s3 }
 0x3fe   : > { %s1223_s29 = scalar_lea.hbm %s1222_s3, 8  ;;  %p1228_p8 = scmp.lt.s32.totalorder %s1222_s3, %s1825_s25 }
 0x3ff   : > { %p1224_p10 = scmp.ne.s32.totalorder %s1222_s3, %s1223_s29  ;;  %p1229_p5 = scmp.lt.s32.totalorder %s1227_s2, %s1223_s29 }
 0x401   : > { %p1225_p12 = pnand %p1224_p10, %p1595_p7  ;;  %p1230_p6 = por %p1229_p5, %p1228_p8 }
 0x403   : > { %p1226_p13 = pneg %p1225_p12 }
 0x405   : > { %p1231_p11 = pnand %p1230_p6, %p1226_p13 }
 0x407   : > { %1234 = shalt.err (!%p1231_p11)
}
 0x408   : > { %905 = dma.vmem_to_hbm [thread:$0]  (%p1595_p7), %s701_s15, 128, %s703_s5, %s686_s26  }
 0x409 PF: > { %s1826_s27 = sld [smem:[#allocation20_spill]]  ;;  %p933_p0 = scmp.ge.s32.totalorder %s1353_s19, 2 }
 0x40b   : > { %p925_p9 = pnand %p933_p0, %p1602_p2 }
 0x40d   : > { %p926_p4 = pneg %p925_p9 }
 0x40f   : > { %s714_s6 = sand.u32 1, %s1826_s27  }
 0x410   : > { %s715_s9 = scalar_lea.sflag [#allocation7], %s714_s6 }
 0x411   : > { %1300 = dma.done.wait (%p926_p4), %s715_s9, 128  }
 0x412   : > { %1302 = vsyncadd (%p926_p4), %s715_s9, 4294967168  ;;  %s29_s19 = sadd.s32 1, %s1353_s19   ;;  %s1829_s30 = sld [smem:[#allocation19_spill]] }
 0x413   : > { %p1703_p3 = scmp.ge.s32.totalorder %s29_s19, 14   ;;  %s1830_s22 = sld [smem:[#allocation27_spill]] }
 0x414   : > { %s1831_s1 = sld [smem:[#allocation30_spill]]  ;;  %s1832_s10 = smov %s1313_s11 }
 0x415   : > { %s1833_s11 = smov %s1618_s7  ;;  %s1834_s7 = smov %s1321_s12 }
 0x416   : > { %s1835_s12 = smov %s1325_s8  ;;  %s1836_s8 = smov %s1613_s24 }
 0x417   : > { %s1837_s13 = smov %s1341_s16  ;;  %s1838_s14 = smov %s1345_s17 }
 0x418   : > { %s1839_s15 = smov %s1349_s18  ;;  %s1840_s16 = smov %s1844_s21 }
 0x419   : > { %s1841_s17 = smov %s1830_s22  ;;  %28 = sbr.rel (!%p1703_p3) target bundleno = 21 (0x15), region = 141 }
 0x41a   : > { %s1842_s18 = smov %s1831_s1 }
 0x41e   :  { %721 = vsyncpa [#allocation6], 1 }
 0x41f   :  { %723 = vsyncpa [#allocation6 + $0x1], 1 }
 0x420   :  { %724 = vsyncpa [#allocation9], 1 }
 0x421   :  { %726 = vsyncpa [#allocation9 + $0x1], 1 }
 0x422   :  { %727 = vsyncpa [#allocation12], 1 }
 0x423   :  { %728 = vsyncpa [#allocation7], 1 }
 0x424   :  { %730 = vsyncpa [#allocation7 + $0x1], 1 }

</bundles_post_ra>
